<compile_context>
chip_gen: v6e
topology: v6e:2x2x1
jax: 0.10.0
libtpu: 0.0.40
codegen_flags: <defaults>
</compile_context>

<pallas_src>
import functools
import math

import jax
import jax.numpy as jnp
from jax.experimental import pallas as pl
from jax.experimental.pallas import tpu as pltpu

NEG = -1e30  # plain Python float -> jaxpr literal (no captured kernel constant)


def _topk_keep_mask(score, valid, k):
    """Exact per-graph top-k selection expressed as a boolean keep mask.

    rank_i = #{j : score_j beats score_i}; keep node i iff rank_i < k and node is valid.
    The rank is a lane-axis (XLU) reduction of a [B, N, N] bool 'beats' tensor — no MXU
    mat-vec, no materialized f32 [B, N, N] temp beyond the reduction operand.
    """
    B, N = score.shape
    sm = score if valid is None else jnp.where(valid, score, NEG)
    si = sm[:, :, None]                                     # candidate i
    sj = sm[:, None, :]                                     # competitor j
    ii = jax.lax.broadcasted_iota(jnp.int32, (N, N), 0)
    jj = jax.lax.broadcasted_iota(jnp.int32, (N, N), 1)
    tie = (jj < ii)[None, :, :]                             # lower index wins on exact ties
    beats = (sj > si) | ((sj == si) & tie)                  # [B, N, N] bool
    rank = jnp.sum(beats.astype(jnp.float32), axis=-1)      # XLU lane reduce; exact integers
    keep = rank < k
    if valid is not None:
        keep = keep & valid
    return keep


def gnn_kernel(adj_ref, x_ref,
               wrel1_ref, wroot1_ref, b1_ref, p1_ref,
               wrel2_ref, wroot2_ref, b2_ref, p2_ref,
               wl1a_ref, wl1b_ref, bl1_ref, wl2_ref, bl2_ref,
               out_ref, *, k1, k2):
    adj = adj_ref[...]                                      # [bB, N, N] bf16 ({0,1}: exact)
    x = x_ref[...]                                          # [bB, N, C] bf16 (host-cast)
    bB, N, C = x.shape
    H = wrel1_ref.shape[1]

    # ---- conv1 = GraphConv(C, H): lin_rel(sum_{j in N(i)} x_j) + lin_root(x_i) ----
    agg1 = jnp.einsum('bij,bjc->bic', adj, x,
                      preferred_element_type=jnp.float32)   # [bB, N, C] f32 accumulate
    h1 = (jnp.dot(agg1.astype(jnp.bfloat16).reshape(bB * N, C), wrel1_ref[...],
                  preferred_element_type=jnp.float32)
          + jnp.dot(x.reshape(bB * N, C), wroot1_ref[...],
                    preferred_element_type=jnp.float32)
          + b1_ref[...])
    h1 = jnp.maximum(h1, 0.0)                               # relu, [bB*N, H] f32
    h1_b = h1.reshape(bB, N, H)

    # ---- pool1 = TopKPooling(H, ratio=0.8): score = tanh(h . p / ||p||) (p pre-normalized) ----
    s1 = jnp.tanh(jnp.sum(h1_b * p1_ref[...], axis=-1))     # VPU mul + XLU lane reduce, [bB, N]
    keep1 = _topk_keep_mask(s1, None, k1)
    gate1 = s1 * keep1.astype(jnp.float32)                  # kept nodes scaled, others zeroed
    xp1_b = h1_b * gate1[:, :, None]                        # [bB, N, H]

    # ---- readout 1: [global_mean_pool || global_max_pool] (kept un-concatenated) ----
    mean1 = jnp.sum(xp1_b, axis=1) * (1.0 / k1)             # [bB, H]
    max1 = jnp.max(jnp.where(keep1[:, :, None], xp1_b, NEG), axis=1)

    # ---- conv2 on the pooled subgraph ----
    # adj is used unmasked: dropped source nodes are already zero in xp1, and rows of dropped
    # targets can never be selected by pool2 (valid=keep1) nor read by the readouts.
    xp1_bf = xp1_b.astype(jnp.bfloat16)
    agg2 = jnp.einsum('bij,bjh->bih', adj, xp1_bf,
                      preferred_element_type=jnp.float32)   # [bB, N, H]
    h2 = (jnp.dot(agg2.astype(jnp.bfloat16).reshape(bB * N, H), wrel2_ref[...],
                  preferred_element_type=jnp.float32)
          + jnp.dot(xp1_bf.reshape(bB * N, H), wroot2_ref[...],
                    preferred_element_type=jnp.float32)
          + b2_ref[...])
    h2 = jnp.maximum(h2, 0.0)                               # [bB*N, H]
    h2_b = h2.reshape(bB, N, H)

    # ---- pool2 ----
    s2 = jnp.tanh(jnp.sum(h2_b * p2_ref[...], axis=-1))
    keep2 = _topk_keep_mask(s2, keep1, k2)
    gate2 = s2 * keep2.astype(jnp.float32)
    xp2_b = h2_b * gate2[:, :, None]

    # ---- readout 2 ----
    mean2 = jnp.sum(xp2_b, axis=1) * (1.0 / k2)
    max2 = jnp.max(jnp.where(keep2[:, :, None], xp2_b, NEG), axis=1)

    # ---- MLP head: x = x1 + x2 ; linear1 ; relu ; dropout(eval) ; linear2 ; relu ----
    # lane-axis concat avoided: [mean||max] @ wl1 == mean @ wl1[:H] + max @ wl1[H:]
    mean_s = (mean1 + mean2).astype(jnp.bfloat16)
    max_s = (max1 + max2).astype(jnp.bfloat16)
    y = (jnp.dot(mean_s, wl1a_ref[...], preferred_element_type=jnp.float32)
         + jnp.dot(max_s, wl1b_ref[...], preferred_element_type=jnp.float32)
         + bl1_ref[...])
    y = jnp.maximum(y, 0.0)
    # TODO(synk): F.dropout(p=0.5, training=self.training) is RNG-dependent; implemented as
    # eval-mode identity here.
    # wl2/bl2 are zero-padded to 128 logit lanes on the host -> lane-dense unmasked store.
    z = jnp.dot(y.astype(jnp.bfloat16), wl2_ref[...],
                preferred_element_type=jnp.float32) + bl2_ref[...]
    out_ref[...] = jnp.maximum(z, 0.0)[:, None, :]          # [bB, 1, out_pad]


def _vmem_capacity_bytes():
    """Trace-time VMEM capacity query; falls back to the tightest generation (v7x: 64 MiB/TC)."""
    try:
        return int(pltpu.get_tpu_info().vmem_capacity_bytes)
    except Exception:
        return 64 << 20


def _pick_batch_block(B, N, C, H):
    """Generation-aware batch tile: fits the per-step working set in VMEM and keeps the grid
    at >= 2 steps (pipelining + megacore sharding on v7x) whenever B allows."""
    vmem_cap = _vmem_capacity_bytes()
    if vmem_cap <= (64 << 20):           # v7x-class: 64 MiB per TensorCore
        vmem_limit = 40 << 20
    else:                                # v5e / v6e: 128 MiB
        vmem_limit = 96 << 20

    per_graph = (2 * (N * N + N * C) * 2     # double-buffered bf16 adj + x tiles
                 + 3 * N * N * 4             # top-k 'beats' / rank temporaries
                 + 12 * N * H * 4)           # f32/bf16 activation temporaries (agg/h/xp/z)
    budget = int(vmem_limit * 0.6)
    cap_by_vmem = max(1, budget // max(per_graph, 1))

    min_steps = min(B, 4)                    # >= 2 steps when B >= 2; ~4 when B allows
    cap_by_grid = max(1, B // max(min_steps, 1))

    cap = max(1, min(B, cap_by_vmem, cap_by_grid))
    for cand in range(cap, 0, -1):           # largest divisor of B under the cap
        if B % cand == 0:
            return cand, vmem_limit
    return 1, vmem_limit


def graph_classifier2_forward(x, adj, params, *, ratio=0.8, batch_block=None, buffer_depth=2):
    B, N, C = x.shape
    H = params['wrel1'].shape[1]
    hq = params['wl1'].shape[1]
    num_classes = params['wl2'].shape[1]
    k1 = math.ceil(ratio * N)                # TopKPooling #1: k = ceil(ratio * nodes_per_graph)
    k2 = math.ceil(ratio * k1)               # TopKPooling #2 operates on the k1 surviving nodes
    out_pad = ((num_classes + 127) // 128) * 128  # lane-dense logits slab

    # ---- Host-side prepacking (one-time, outside the kernel) ----
    adj_bf = adj.astype(jnp.bfloat16)        # {0,1} -> exact; halves the dominant adj DMA
    x_bf = x.astype(jnp.bfloat16)            # halves the x DMA / VMEM tile
    wrel1 = params['wrel1'].astype(jnp.bfloat16)
    wroot1 = params['wroot1'].astype(jnp.bfloat16)
    wrel2 = params['wrel2'].astype(jnp.bfloat16)
    wroot2 = params['wroot2'].astype(jnp.bfloat16)
    p1 = params['p1'].reshape(1, H).astype(jnp.float32)
    p1 = p1 / jnp.sqrt(jnp.sum(p1 * p1))     # fold TopKPooling's 1/||p|| into the vector
    p2 = params['p2'].reshape(1, H).astype(jnp.float32)
    p2 = p2 / jnp.sqrt(jnp.sum(p2 * p2))
    wl1a = params['wl1'][:H, :].astype(jnp.bfloat16)
    wl1b = params['wl1'][H:, :].astype(jnp.bfloat16)
    wl2 = jnp.zeros((hq, out_pad), jnp.bfloat16).at[:, :num_classes].set(
        params['wl2'].astype(jnp.bfloat16))
    bl2 = jnp.zeros((1, out_pad), jnp.float32).at[:, :num_classes].set(params['bl2'])

    if batch_block is not None:
        bB, vmem_limit = batch_block, _pick_batch_block(B, N, C, H)[1]
    else:
        bB, vmem_limit = _pick_batch_block(B, N, C, H)
    assert B % bB == 0, "batch_block must divide B"

    bs_kwargs = {} if buffer_depth == 2 else {'pipeline_mode': pl.Buffered(buffer_depth)}

    def tiled(shape):
        nd = len(shape)
        return pl.BlockSpec(shape, lambda b, _nd=nd: (b,) + (0,) * (_nd - 1), **bs_kwargs)

    def whole(a):
        return pl.BlockSpec(a.shape, lambda b, _nd=a.ndim: (0,) * _nd)

    args = (adj_bf, x_bf,
            wrel1, wroot1, params['brel1'], p1,
            wrel2, wroot2, params['brel2'], p2,
            wl1a, wl1b, params['bl1'], wl2, bl2)
    in_specs = [tiled((bB, N, N)), tiled((bB, N, C))] + [whole(a) for a in args[2:]]

    flops = int(2 * B * N * N * (C + H)          # two neighbour aggregations
                + 4 * B * N * (C * H + H * H)    # conv weight matmuls (rel + root)
                + 4 * B * N * N                  # two top-k rank reductions
                + 4 * B * N * H                  # two pooling scores
                + 4 * B * H * hq + 2 * B * hq * out_pad)
    bytes_accessed = int(adj_bf.size * 2 + x_bf.size * 2 + B * out_pad * 4
                         + sum(int(a.size) * 4 for a in args[2:]))
    cost = pl.CostEstimate(flops=flops, transcendentals=2 * B * N,
                           bytes_accessed=bytes_accessed)

    kernel = functools.partial(gnn_kernel, k1=k1, k2=k2)
    out = pl.pallas_call(
        kernel,
        out_shape=jax.ShapeDtypeStruct((B, 1, out_pad), jnp.float32),
        grid=(B // bB,),
        in_specs=in_specs,
        out_specs=pl.BlockSpec((bB, 1, out_pad), lambda b: (b, 0, 0)),
        compiler_params=pltpu.CompilerParams(
            dimension_semantics=("parallel",),       # graphs are independent -> megacore/2-TC
            vmem_limit_bytes=vmem_limit,             # generation-aware (v7x 64 MiB vs 128 MiB)
        ),
        cost_estimate=cost,
    )(*args)
    return out[:, 0, :num_classes]


def init_params(key, in_channels, hidden_channels, num_classes):
    """Deterministic parameter init; torch layouts pre-transposed to [in, out]."""
    ks = jax.random.split(key, 12)

    def u(k, shape, fan_in):
        b = 1.0 / math.sqrt(fan_in)
        return jax.random.uniform(k, shape, jnp.float32, -b, b)

    H, C, hq = hidden_channels, in_channels, hidden_channels // 4
    return {
        # GraphConv 1: lin_rel (with bias) + lin_root (no bias)
        'wrel1': u(ks[0], (C, H), C), 'brel1': u(ks[1], (1, H), C),
        'wroot1': u(ks[2], (C, H), C),
        # TopKPooling 1 attention vector
        'p1': u(ks[3], (1, H), H),
        # GraphConv 2
        'wrel2': u(ks[4], (H, H), H), 'brel2': u(ks[5], (1, H), H),
        'wroot2': u(ks[6], (H, H), H),
        # TopKPooling 2
        'p2': u(ks[7], (1, H), H),
        # linear1: 2H -> H//4 ; linear2: H//4 -> num_classes
        'wl1': u(ks[8], (2 * H, hq), 2 * H), 'bl1': u(ks[9], (1, hq), 2 * H),
        'wl2': u(ks[10], (hq, num_classes), hq), 'bl2': u(ks[11], (1, num_classes), hq),
    }


if __name__ == "__main__":
    B, N = 2, 16                  # 2 graphs, 16 nodes each (contiguous, equal-sized batch)
    in_channels, hidden_channels, num_classes = 8, 32, 4

    key = jax.random.PRNGKey(0)
    kx, ke, kp = jax.random.split(key, 3)

    x = jax.random.normal(kx, (B, N, in_channels), dtype=jnp.float32)
    adj = jax.random.bernoulli(ke, 0.3, (B, N, N)).astype(jnp.float32)  # adj[b,i,j]=1: edge j->i

    params = init_params(kp, in_channels, hidden_channels, num_classes)

    out = graph_classifier2_forward(x, adj, params, ratio=0.8)
    out = jax.block_until_ready(out)
    assert out.shape == (B, num_classes) and out.dtype == jnp.float32
    print("KERNEL_OK")
</pallas_src>

<mosaic_0001>
module attributes {stable_mosaic.version = 11 : i64} {
  func.func @gnn_kernel(%arg0: i32, %arg1: memref<1x16x16xbf16, #tpu.memory_space<vmem>>, %arg2: memref<1x16x8xbf16, #tpu.memory_space<vmem>>, %arg3: memref<8x32xbf16, #tpu.memory_space<vmem>>, %arg4: memref<8x32xbf16, #tpu.memory_space<vmem>>, %arg5: memref<1x32xf32, #tpu.memory_space<vmem>>, %arg6: memref<1x32xf32, #tpu.memory_space<vmem>>, %arg7: memref<32x32xbf16, #tpu.memory_space<vmem>>, %arg8: memref<32x32xbf16, #tpu.memory_space<vmem>>, %arg9: memref<1x32xf32, #tpu.memory_space<vmem>>, %arg10: memref<1x32xf32, #tpu.memory_space<vmem>>, %arg11: memref<32x8xbf16, #tpu.memory_space<vmem>>, %arg12: memref<32x8xbf16, #tpu.memory_space<vmem>>, %arg13: memref<1x8xf32, #tpu.memory_space<vmem>>, %arg14: memref<8x128xbf16, #tpu.memory_space<vmem>>, %arg15: memref<1x128xf32, #tpu.memory_space<vmem>>, %arg16: memref<1x1x128xf32, #tpu.memory_space<vmem>>) attributes {dimension_semantics = [#tpu.dimension_semantics<parallel>], iteration_bounds = array<i64: 2>, scalar_prefetch = 0 : i64, scratch_operands = 0 : i64, tpu.core_type = #tpu.core_type<tc>, window_params = [{transform_indices = @transform_0, window_bounds = array<i64: 1, 16, 16>}, {transform_indices = @transform_1, window_bounds = array<i64: 1, 16, 8>}, {pipeline_mode = #tpu.pipeline_mode<synchronous>, transform_indices = @transform_2, window_bounds = array<i64: 8, 32>}, {pipeline_mode = #tpu.pipeline_mode<synchronous>, transform_indices = @transform_3, window_bounds = array<i64: 8, 32>}, {pipeline_mode = #tpu.pipeline_mode<synchronous>, transform_indices = @transform_4, window_bounds = array<i64: 1, 32>}, {pipeline_mode = #tpu.pipeline_mode<synchronous>, transform_indices = @transform_5, window_bounds = array<i64: 1, 32>}, {pipeline_mode = #tpu.pipeline_mode<synchronous>, transform_indices = @transform_6, window_bounds = array<i64: 32, 32>}, {pipeline_mode = #tpu.pipeline_mode<synchronous>, transform_indices = @transform_7, window_bounds = array<i64: 32, 32>}, {pipeline_mode = #tpu.pipeline_mode<synchronous>, transform_indices = @transform_8, window_bounds = array<i64: 1, 32>}, {pipeline_mode = #tpu.pipeline_mode<synchronous>, transform_indices = @transform_9, window_bounds = array<i64: 1, 32>}, {pipeline_mode = #tpu.pipeline_mode<synchronous>, transform_indices = @transform_10, window_bounds = array<i64: 32, 8>}, {pipeline_mode = #tpu.pipeline_mode<synchronous>, transform_indices = @transform_11, window_bounds = array<i64: 32, 8>}, {pipeline_mode = #tpu.pipeline_mode<synchronous>, transform_indices = @transform_12, window_bounds = array<i64: 1, 8>}, {pipeline_mode = #tpu.pipeline_mode<synchronous>, transform_indices = @transform_13, window_bounds = array<i64: 8, 128>}, {pipeline_mode = #tpu.pipeline_mode<synchronous>, transform_indices = @transform_14, window_bounds = array<i64: 1, 128>}, {transform_indices = @transform_15, window_bounds = array<i64: 1, 1, 128>}]} {
    %c0 = arith.constant 0 : index
    %c0_0 = arith.constant 0 : index
    %c0_1 = arith.constant 0 : index
    %0 = vector.load %arg1[%c0, %c0_0, %c0_1] : memref<1x16x16xbf16, #tpu.memory_space<vmem>>, vector<1x16x16xbf16>
    %c0_2 = arith.constant 0 : index
    %c0_3 = arith.constant 0 : index
    %c0_4 = arith.constant 0 : index
    %1 = vector.load %arg2[%c0_2, %c0_3, %c0_4] : memref<1x16x8xbf16, #tpu.memory_space<vmem>>, vector<1x16x8xbf16>
    "tpu.trace_start"() <{level = 10 : i32, message = "bij,bjc->bic"}> : () -> ()
    %cst = arith.constant dense<0.000000e+00> : vector<1x16x8xf32>
    %2 = tpu.matmul %0, %1, %cst {dimension_numbers = #tpu.dot_dimension_numbers<[2], [1], [1], [2], [0, 0, 0, 1, 1, 2], [0], [0]>} : vector<1x16x16xbf16>, vector<1x16x8xbf16>, vector<1x16x8xf32> -> vector<1x16x8xf32>
    "tpu.trace_stop"() : () -> ()
    %3 = arith.truncf %2 : vector<1x16x8xf32> to vector<1x16x8xbf16>
    %4 = vector.shape_cast %3 : vector<1x16x8xbf16> to vector<16x8xbf16>
    %c0_5 = arith.constant 0 : index
    %c0_6 = arith.constant 0 : index
    %5 = vector.load %arg3[%c0_5, %c0_6] : memref<8x32xbf16, #tpu.memory_space<vmem>>, vector<8x32xbf16>
    %cst_7 = arith.constant dense<0.000000e+00> : vector<16x32xf32>
    %6 = tpu.matmul %4, %5, %cst_7 {dimension_numbers = #tpu.dot_dimension_numbers<[1], [0], [0], [1], [0, 0, 1, 1], [], []>} : vector<16x8xbf16>, vector<8x32xbf16>, vector<16x32xf32> -> vector<16x32xf32>
    %7 = vector.shape_cast %1 : vector<1x16x8xbf16> to vector<16x8xbf16>
    %c0_8 = arith.constant 0 : index
    %c0_9 = arith.constant 0 : index
    %8 = vector.load %arg4[%c0_8, %c0_9] : memref<8x32xbf16, #tpu.memory_space<vmem>>, vector<8x32xbf16>
    %cst_10 = arith.constant dense<0.000000e+00> : vector<16x32xf32>
    %9 = tpu.matmul %7, %8, %cst_10 {dimension_numbers = #tpu.dot_dimension_numbers<[1], [0], [0], [1], [0, 0, 1, 1], [], []>} : vector<16x8xbf16>, vector<8x32xbf16>, vector<16x32xf32> -> vector<16x32xf32>
    %10 = arith.addf %6, %9 : vector<16x32xf32>
    %c0_11 = arith.constant 0 : index
    %c0_12 = arith.constant 0 : index
    %11 = vector.load %arg5[%c0_11, %c0_12] : memref<1x32xf32, #tpu.memory_space<vmem>>, vector<1x32xf32>
    %12 = vector.broadcast %11 : vector<1x32xf32> to vector<16x32xf32>
    %13 = arith.addf %10, %12 : vector<16x32xf32>
    %cst_13 = arith.constant 0.000000e+00 : f32
    %14 = vector.broadcast %cst_13 : f32 to vector<16x32xf32>
    %15 = arith.maximumf %13, %14 : vector<16x32xf32>
    %16 = vector.shape_cast %15 : vector<16x32xf32> to vector<1x16x32xf32>
    %c0_14 = arith.constant 0 : index
    %c0_15 = arith.constant 0 : index
    %17 = vector.load %arg6[%c0_14, %c0_15] : memref<1x32xf32, #tpu.memory_space<vmem>>, vector<1x32xf32>
    %18 = vector.shape_cast %17 : vector<1x32xf32> to vector<1x1x32xf32>
    %19 = vector.broadcast %18 : vector<1x1x32xf32> to vector<1x16x32xf32>
    %20 = arith.mulf %16, %19 : vector<1x16x32xf32>
    %cst_16 = arith.constant dense<0.000000e+00> : vector<1x16xf32>
    %21 = vector.multi_reduction <add>, %20, %cst_16 [2] : vector<1x16x32xf32> to vector<1x16xf32>
    %22 = math.tanh %21 : vector<1x16xf32>
    %23 = vector.shape_cast %22 : vector<1x16xf32> to vector<1x16x1xf32>
    %24 = vector.shape_cast %22 : vector<1x16xf32> to vector<1x1x16xf32>
    %25 = tpu.iota {dimensions = array<i32: 0>} : vector<16x16xi32>
    %26 = tpu.iota {dimensions = array<i32: 1>} : vector<16x16xi32>
    %27 = arith.cmpi slt, %26, %25 : vector<16x16xi32>
    %28 = vector.shape_cast %27 : vector<16x16xi1> to vector<1x16x16xi1>
    %29 = vector.broadcast %24 : vector<1x1x16xf32> to vector<1x16x16xf32>
    %30 = vector.broadcast %23 : vector<1x16x1xf32> to vector<1x16x16xf32>
    %31 = arith.cmpf ogt, %29, %30 : vector<1x16x16xf32>
    %32 = vector.broadcast %24 : vector<1x1x16xf32> to vector<1x16x16xf32>
    %33 = vector.broadcast %23 : vector<1x16x1xf32> to vector<1x16x16xf32>
    %34 = arith.cmpf oeq, %32, %33 : vector<1x16x16xf32>
    %35 = arith.andi %34, %28 : vector<1x16x16xi1>
    %36 = arith.ori %31, %35 : vector<1x16x16xi1>
    %37 = arith.extui %36 : vector<1x16x16xi1> to vector<1x16x16xi32>
    %38 = arith.sitofp %37 : vector<1x16x16xi32> to vector<1x16x16xf32>
    %cst_17 = arith.constant dense<0.000000e+00> : vector<1x16xf32>
    %39 = vector.multi_reduction <add>, %38, %cst_17 [2] : vector<1x16x16xf32> to vector<1x16xf32>
    %cst_18 = arith.constant 1.300000e+01 : f32
    %40 = vector.broadcast %cst_18 : f32 to vector<1x16xf32>
    %41 = arith.cmpf olt, %39, %40 : vector<1x16xf32>
    %42 = arith.extui %41 : vector<1x16xi1> to vector<1x16xi32>
    %43 = arith.sitofp %42 : vector<1x16xi32> to vector<1x16xf32>
    %44 = arith.mulf %22, %43 : vector<1x16xf32>
    %45 = vector.shape_cast %44 : vector<1x16xf32> to vector<1x16x1xf32>
    %46 = vector.broadcast %45 : vector<1x16x1xf32> to vector<1x16x32xf32>
    %47 = arith.mulf %16, %46 : vector<1x16x32xf32>
    %cst_19 = arith.constant dense<0.000000e+00> : vector<1x32xf32>
    %48 = vector.multi_reduction <add>, %47, %cst_19 [1] : vector<1x16x32xf32> to vector<1x32xf32>
    %cst_20 = arith.constant 0.0769230798 : f32
    %49 = vector.broadcast %cst_20 : f32 to vector<1x32xf32>
    %50 = arith.mulf %48, %49 : vector<1x32xf32>
    %51 = vector.shape_cast %41 : vector<1x16xi1> to vector<1x16x1xi1>
    %cst_21 = arith.constant -1.000000e+30 : f32
    %52 = vector.shape_cast %51 : vector<1x16x1xi1> to vector<1x16x1xi1>
    %53 = vector.broadcast %52 : vector<1x16x1xi1> to vector<1x16x32xi1>
    %54 = vector.broadcast %cst_21 : f32 to vector<1x16x32xf32>
    %55 = arith.select %53, %47, %54 : vector<1x16x32xi1>, vector<1x16x32xf32>
    %cst_22 = arith.constant dense<0xFF800000> : vector<1x32xf32>
    %56 = vector.multi_reduction <maximumf>, %55, %cst_22 [1] : vector<1x16x32xf32> to vector<1x32xf32>
    %57 = arith.truncf %47 : vector<1x16x32xf32> to vector<1x16x32xbf16>
    "tpu.trace_start"() <{level = 10 : i32, message = "bij,bjh->bih"}> : () -> ()
    %cst_23 = arith.constant dense<0.000000e+00> : vector<1x16x32xf32>
    %58 = tpu.matmul %0, %57, %cst_23 {dimension_numbers = #tpu.dot_dimension_numbers<[2], [1], [1], [2], [0, 0, 0, 1, 1, 2], [0], [0]>} : vector<1x16x16xbf16>, vector<1x16x32xbf16>, vector<1x16x32xf32> -> vector<1x16x32xf32>
    "tpu.trace_stop"() : () -> ()
    %59 = arith.truncf %58 : vector<1x16x32xf32> to vector<1x16x32xbf16>
    %60 = vector.shape_cast %59 : vector<1x16x32xbf16> to vector<16x32xbf16>
    %c0_24 = arith.constant 0 : index
    %c0_25 = arith.constant 0 : index
    %61 = vector.load %arg7[%c0_24, %c0_25] : memref<32x32xbf16, #tpu.memory_space<vmem>>, vector<32x32xbf16>
    %cst_26 = arith.constant dense<0.000000e+00> : vector<16x32xf32>
    %62 = tpu.matmul %60, %61, %cst_26 {dimension_numbers = #tpu.dot_dimension_numbers<[1], [0], [0], [1], [0, 0, 1, 1], [], []>} : vector<16x32xbf16>, vector<32x32xbf16>, vector<16x32xf32> -> vector<16x32xf32>
    %63 = vector.shape_cast %57 : vector<1x16x32xbf16> to vector<16x32xbf16>
    %c0_27 = arith.constant 0 : index
    %c0_28 = arith.constant 0 : index
    %64 = vector.load %arg8[%c0_27, %c0_28] : memref<32x32xbf16, #tpu.memory_space<vmem>>, vector<32x32xbf16>
    %cst_29 = arith.constant dense<0.000000e+00> : vector<16x32xf32>
    %65 = tpu.matmul %63, %64, %cst_29 {dimension_numbers = #tpu.dot_dimension_numbers<[1], [0], [0], [1], [0, 0, 1, 1], [], []>} : vector<16x32xbf16>, vector<32x32xbf16>, vector<16x32xf32> -> vector<16x32xf32>
    %66 = arith.addf %62, %65 : vector<16x32xf32>
    %c0_30 = arith.constant 0 : index
    %c0_31 = arith.constant 0 : index
    %67 = vector.load %arg9[%c0_30, %c0_31] : memref<1x32xf32, #tpu.memory_space<vmem>>, vector<1x32xf32>
    %68 = vector.broadcast %67 : vector<1x32xf32> to vector<16x32xf32>
    %69 = arith.addf %66, %68 : vector<16x32xf32>
    %cst_32 = arith.constant 0.000000e+00 : f32
    %70 = vector.broadcast %cst_32 : f32 to vector<16x32xf32>
    %71 = arith.maximumf %69, %70 : vector<16x32xf32>
    %72 = vector.shape_cast %71 : vector<16x32xf32> to vector<1x16x32xf32>
    %c0_33 = arith.constant 0 : index
    %c0_34 = arith.constant 0 : index
    %73 = vector.load %arg10[%c0_33, %c0_34] : memref<1x32xf32, #tpu.memory_space<vmem>>, vector<1x32xf32>
    %74 = vector.shape_cast %73 : vector<1x32xf32> to vector<1x1x32xf32>
    %75 = vector.broadcast %74 : vector<1x1x32xf32> to vector<1x16x32xf32>
    %76 = arith.mulf %72, %75 : vector<1x16x32xf32>
    %cst_35 = arith.constant dense<0.000000e+00> : vector<1x16xf32>
    %77 = vector.multi_reduction <add>, %76, %cst_35 [2] : vector<1x16x32xf32> to vector<1x16xf32>
    %78 = math.tanh %77 : vector<1x16xf32>
    %cst_36 = arith.constant -1.000000e+30 : f32
    %79 = vector.broadcast %cst_36 : f32 to vector<1x16xf32>
    %80 = arith.select %41, %78, %79 : vector<1x16xi1>, vector<1x16xf32>
    %81 = vector.shape_cast %80 : vector<1x16xf32> to vector<1x16x1xf32>
    %82 = vector.shape_cast %80 : vector<1x16xf32> to vector<1x1x16xf32>
    %83 = tpu.iota {dimensions = array<i32: 0>} : vector<16x16xi32>
    %84 = tpu.iota {dimensions = array<i32: 1>} : vector<16x16xi32>
    %85 = arith.cmpi slt, %84, %83 : vector<16x16xi32>
    %86 = vector.shape_cast %85 : vector<16x16xi1> to vector<1x16x16xi1>
    %87 = vector.broadcast %82 : vector<1x1x16xf32> to vector<1x16x16xf32>
    %88 = vector.broadcast %81 : vector<1x16x1xf32> to vector<1x16x16xf32>
    %89 = arith.cmpf ogt, %87, %88 : vector<1x16x16xf32>
    %90 = vector.broadcast %82 : vector<1x1x16xf32> to vector<1x16x16xf32>
    %91 = vector.broadcast %81 : vector<1x16x1xf32> to vector<1x16x16xf32>
    %92 = arith.cmpf oeq, %90, %91 : vector<1x16x16xf32>
    %93 = arith.andi %92, %86 : vector<1x16x16xi1>
    %94 = arith.ori %89, %93 : vector<1x16x16xi1>
    %95 = arith.extui %94 : vector<1x16x16xi1> to vector<1x16x16xi32>
    %96 = arith.sitofp %95 : vector<1x16x16xi32> to vector<1x16x16xf32>
    %cst_37 = arith.constant dense<0.000000e+00> : vector<1x16xf32>
    %97 = vector.multi_reduction <add>, %96, %cst_37 [2] : vector<1x16x16xf32> to vector<1x16xf32>
    %cst_38 = arith.constant 1.100000e+01 : f32
    %98 = vector.broadcast %cst_38 : f32 to vector<1x16xf32>
    %99 = arith.cmpf olt, %97, %98 : vector<1x16xf32>
    %100 = arith.andi %99, %41 : vector<1x16xi1>
    %101 = arith.extui %100 : vector<1x16xi1> to vector<1x16xi32>
    %102 = arith.sitofp %101 : vector<1x16xi32> to vector<1x16xf32>
    %103 = arith.mulf %78, %102 : vector<1x16xf32>
    %104 = vector.shape_cast %103 : vector<1x16xf32> to vector<1x16x1xf32>
    %105 = vector.broadcast %104 : vector<1x16x1xf32> to vector<1x16x32xf32>
    %106 = arith.mulf %72, %105 : vector<1x16x32xf32>
    %cst_39 = arith.constant dense<0.000000e+00> : vector<1x32xf32>
    %107 = vector.multi_reduction <add>, %106, %cst_39 [1] : vector<1x16x32xf32> to vector<1x32xf32>
    %cst_40 = arith.constant 0.0909090936 : f32
    %108 = vector.broadcast %cst_40 : f32 to vector<1x32xf32>
    %109 = arith.mulf %107, %108 : vector<1x32xf32>
    %110 = vector.shape_cast %100 : vector<1x16xi1> to vector<1x16x1xi1>
    %cst_41 = arith.constant -1.000000e+30 : f32
    %111 = vector.shape_cast %110 : vector<1x16x1xi1> to vector<1x16x1xi1>
    %112 = vector.broadcast %111 : vector<1x16x1xi1> to vector<1x16x32xi1>
    %113 = vector.broadcast %cst_41 : f32 to vector<1x16x32xf32>
    %114 = arith.select %112, %106, %113 : vector<1x16x32xi1>, vector<1x16x32xf32>
    %cst_42 = arith.constant dense<0xFF800000> : vector<1x32xf32>
    %115 = vector.multi_reduction <maximumf>, %114, %cst_42 [1] : vector<1x16x32xf32> to vector<1x32xf32>
    %116 = arith.addf %50, %109 : vector<1x32xf32>
    %117 = arith.truncf %116 : vector<1x32xf32> to vector<1x32xbf16>
    %118 = arith.addf %56, %115 : vector<1x32xf32>
    %119 = arith.truncf %118 : vector<1x32xf32> to vector<1x32xbf16>
    %c0_43 = arith.constant 0 : index
    %c0_44 = arith.constant 0 : index
    %120 = vector.load %arg11[%c0_43, %c0_44] : memref<32x8xbf16, #tpu.memory_space<vmem>>, vector<32x8xbf16>
    %cst_45 = arith.constant dense<0.000000e+00> : vector<1x8xf32>
    %121 = tpu.matmul %117, %120, %cst_45 {dimension_numbers = #tpu.dot_dimension_numbers<[1], [0], [0], [1], [0, 0, 1, 1], [], []>} : vector<1x32xbf16>, vector<32x8xbf16>, vector<1x8xf32> -> vector<1x8xf32>
    %c0_46 = arith.constant 0 : index
    %c0_47 = arith.constant 0 : index
    %122 = vector.load %arg12[%c0_46, %c0_47] : memref<32x8xbf16, #tpu.memory_space<vmem>>, vector<32x8xbf16>
    %cst_48 = arith.constant dense<0.000000e+00> : vector<1x8xf32>
    %123 = tpu.matmul %119, %122, %cst_48 {dimension_numbers = #tpu.dot_dimension_numbers<[1], [0], [0], [1], [0, 0, 1, 1], [], []>} : vector<1x32xbf16>, vector<32x8xbf16>, vector<1x8xf32> -> vector<1x8xf32>
    %124 = arith.addf %121, %123 : vector<1x8xf32>
    %c0_49 = arith.constant 0 : index
    %c0_50 = arith.constant 0 : index
    %125 = vector.load %arg13[%c0_49, %c0_50] : memref<1x8xf32, #tpu.memory_space<vmem>>, vector<1x8xf32>
    %126 = arith.addf %124, %125 : vector<1x8xf32>
    %cst_51 = arith.constant 0.000000e+00 : f32
    %127 = vector.broadcast %cst_51 : f32 to vector<1x8xf32>
    %128 = arith.maximumf %126, %127 : vector<1x8xf32>
    %129 = arith.truncf %128 : vector<1x8xf32> to vector<1x8xbf16>
    %c0_52 = arith.constant 0 : index
    %c0_53 = arith.constant 0 : index
    %130 = vector.load %arg14[%c0_52, %c0_53] : memref<8x128xbf16, #tpu.memory_space<vmem>>, vector<8x128xbf16>
    %cst_54 = arith.constant dense<0.000000e+00> : vector<1x128xf32>
    %131 = tpu.matmul %129, %130, %cst_54 {dimension_numbers = #tpu.dot_dimension_numbers<[1], [0], [0], [1], [0, 0, 1, 1], [], []>} : vector<1x8xbf16>, vector<8x128xbf16>, vector<1x128xf32> -> vector<1x128xf32>
    %c0_55 = arith.constant 0 : index
    %c0_56 = arith.constant 0 : index
    %132 = vector.load %arg15[%c0_55, %c0_56] : memref<1x128xf32, #tpu.memory_space<vmem>>, vector<1x128xf32>
    %133 = arith.addf %131, %132 : vector<1x128xf32>
    %cst_57 = arith.constant 0.000000e+00 : f32
    %134 = vector.broadcast %cst_57 : f32 to vector<1x128xf32>
    %135 = arith.maximumf %133, %134 : vector<1x128xf32>
    %136 = vector.shape_cast %135 : vector<1x128xf32> to vector<1x1x128xf32>
    %c0_58 = arith.constant 0 : index
    %c0_59 = arith.constant 0 : index
    %c0_60 = arith.constant 0 : index
    %137 = vector.load %arg16[%c0_58, %c0_59, %c0_60] : memref<1x1x128xf32, #tpu.memory_space<vmem>>, vector<1x1x128xf32>
    tpu.vector_store %arg16[%c0_58, %c0_59, %c0_60], %136 {strides = array<i32>} : memref<1x1x128xf32, #tpu.memory_space<vmem>>, vector<1x1x128xf32>,
    return
  }
  func.func @transform_0(%arg0: i32) -> (i32, i32, i32) {
    %c0_i32 = arith.constant 0 : i32
    %c0_i32_0 = arith.constant 0 : i32
    %c0_i32_1 = arith.constant 0 : i32
    return %arg0, %c0_i32, %c0_i32_0 : i32, i32, i32
  }
  func.func @transform_1(%arg0: i32) -> (i32, i32, i32) {
    %c0_i32 = arith.constant 0 : i32
    %c0_i32_0 = arith.constant 0 : i32
    %c0_i32_1 = arith.constant 0 : i32
    return %arg0, %c0_i32, %c0_i32_0 : i32, i32, i32
  }
  func.func @transform_2(%arg0: i32) -> (i32, i32) {
    %c0_i32 = arith.constant 0 : i32
    %c0_i32_0 = arith.constant 0 : i32
    %c0_i32_1 = arith.constant 0 : i32
    return %c0_i32, %c0_i32_0 : i32, i32
  }
  func.func @transform_3(%arg0: i32) -> (i32, i32) {
    %c0_i32 = arith.constant 0 : i32
    %c0_i32_0 = arith.constant 0 : i32
    %c0_i32_1 = arith.constant 0 : i32
    return %c0_i32, %c0_i32_0 : i32, i32
  }
  func.func @transform_4(%arg0: i32) -> (i32, i32) {
    %c0_i32 = arith.constant 0 : i32
    %c0_i32_0 = arith.constant 0 : i32
    %c0_i32_1 = arith.constant 0 : i32
    return %c0_i32, %c0_i32_0 : i32, i32
  }
  func.func @transform_5(%arg0: i32) -> (i32, i32) {
    %c0_i32 = arith.constant 0 : i32
    %c0_i32_0 = arith.constant 0 : i32
    %c0_i32_1 = arith.constant 0 : i32
    return %c0_i32, %c0_i32_0 : i32, i32
  }
  func.func @transform_6(%arg0: i32) -> (i32, i32) {
    %c0_i32 = arith.constant 0 : i32
    %c0_i32_0 = arith.constant 0 : i32
    %c0_i32_1 = arith.constant 0 : i32
    return %c0_i32, %c0_i32_0 : i32, i32
  }
  func.func @transform_7(%arg0: i32) -> (i32, i32) {
    %c0_i32 = arith.constant 0 : i32
    %c0_i32_0 = arith.constant 0 : i32
    %c0_i32_1 = arith.constant 0 : i32
    return %c0_i32, %c0_i32_0 : i32, i32
  }
  func.func @transform_8(%arg0: i32) -> (i32, i32) {
    %c0_i32 = arith.constant 0 : i32
    %c0_i32_0 = arith.constant 0 : i32
    %c0_i32_1 = arith.constant 0 : i32
    return %c0_i32, %c0_i32_0 : i32, i32
  }
  func.func @transform_9(%arg0: i32) -> (i32, i32) {
    %c0_i32 = arith.constant 0 : i32
    %c0_i32_0 = arith.constant 0 : i32
    %c0_i32_1 = arith.constant 0 : i32
    return %c0_i32, %c0_i32_0 : i32, i32
  }
  func.func @transform_10(%arg0: i32) -> (i32, i32) {
    %c0_i32 = arith.constant 0 : i32
    %c0_i32_0 = arith.constant 0 : i32
    %c0_i32_1 = arith.constant 0 : i32
    return %c0_i32, %c0_i32_0 : i32, i32
  }
  func.func @transform_11(%arg0: i32) -> (i32, i32) {
    %c0_i32 = arith.constant 0 : i32
    %c0_i32_0 = arith.constant 0 : i32
    %c0_i32_1 = arith.constant 0 : i32
    return %c0_i32, %c0_i32_0 : i32, i32
  }
  func.func @transform_12(%arg0: i32) -> (i32, i32) {
    %c0_i32 = arith.constant 0 : i32
    %c0_i32_0 = arith.constant 0 : i32
    %c0_i32_1 = arith.constant 0 : i32
    return %c0_i32, %c0_i32_0 : i32, i32
  }
  func.func @transform_13(%arg0: i32) -> (i32, i32) {
    %c0_i32 = arith.constant 0 : i32
    %c0_i32_0 = arith.constant 0 : i32
    %c0_i32_1 = arith.constant 0 : i32
    return %c0_i32, %c0_i32_0 : i32, i32
  }
  func.func @transform_14(%arg0: i32) -> (i32, i32) {
    %c0_i32 = arith.constant 0 : i32
    %c0_i32_0 = arith.constant 0 : i32
    %c0_i32_1 = arith.constant 0 : i32
    return %c0_i32, %c0_i32_0 : i32, i32
  }
  func.func @transform_15(%arg0: i32) -> (i32, i32, i32) {
    %c0_i32 = arith.constant 0 : i32
    %c0_i32_0 = arith.constant 0 : i32
    %c0_i32_1 = arith.constant 0 : i32
    return %arg0, %c0_i32, %c0_i32_0 : i32, i32, i32
  }
}

</mosaic_0001>

<bundles_post_ra>
// kernel: tpu_custom_call.1
= control target key start
LH: loop header
LB: loop body
LE: loop exit
PB: predicated region body
PF: predicated region fallthrough
CT: control target
= control target key end

     0   :  { %s5054_s0 = inlined_call_operand.vmem [shape: bf16[2,16,16], index: 0, kind: input, shape index: {}]   ;;  %s5055_s1 = inlined_call_operand.vmem [shape: bf16[2,16,8], index: 1, kind: input, shape index: {}]   ;;  %s5056_s2 = inlined_call_operand.vmem [shape: bf16[8,32], index: 2, kind: input, shape index: {}]   ;;  %s5057_s3 = inlined_call_operand.vmem [shape: bf16[8,32], index: 3, kind: input, shape index: {}]   ;;  %s5058_s4 = inlined_call_operand.vmem [shape: f32[1,32], index: 4, kind: input, shape index: {}]   ;;  %s5059_s5 = inlined_call_operand.vmem [shape: f32[1,32], index: 5, kind: input, shape index: {}]   ;;  %s5060_s6 = inlined_call_operand.vmem [shape: bf16[32,32], index: 6, kind: input, shape index: {}]   ;;  %s5061_s7 = inlined_call_operand.vmem [shape: bf16[32,32], index: 7, kind: input, shape index: {}]   ;;  %s5062_s8 = inlined_call_operand.vmem [shape: f32[1,32], index: 8, kind: input, shape index: {}]   ;;  %s5063_s9 = inlined_call_operand.vmem [shape: f32[1,32], index: 9, kind: input, shape index: {}]   ;;  %s5064_s10 = inlined_call_operand.vmem [shape: bf16[32,8], index: 10, kind: input, shape index: {}]   ;;  %s5065_s11 = inlined_call_operand.vmem [shape: bf16[32,8], index: 11, kind: input, shape index: {}]   ;;  %s5066_s12 = inlined_call_operand.vmem [shape: f32[1,8], index: 12, kind: input, shape index: {}]   ;;  %s5067_s13 = inlined_call_operand.vmem [shape: bf16[8,128], index: 13, kind: input, shape index: {}]   ;;  %s5068_s14 = inlined_call_operand.vmem [shape: f32[1,128], index: 14, kind: input, shape index: {}]   ;;  %s5069_s15 = inlined_call_operand.hbm [shape: f32[2,1,128], index: 15, kind: output, shape index: {}]  }
   0x1   :  { %5120 = sst [smem:[#allocation18_spill]] %s5054_s0 }
   0x2   :  { %5121 = sst [smem:[#allocation19_spill]] %s5055_s1 }
   0x3   :  { %5122 = sst [smem:[#allocation20_spill]] %s5056_s2 }
   0x4   :  { %5123 = sst [smem:[#allocation21_spill]] %s5057_s3 }
   0x5   :  { %20 = vsyncpa [#allocation3], 0 }
   0x6   :  { %22 = vsyncpa [#allocation3 + $0x1], 0  ;;  %s3137_s18 = smov 0   ;;  %s3139_s19 = smov 0  }
   0x7   :  { %s3141_s20 = smov 0   ;;  %s3143_s21 = smov 0  }
   0x8 LB: > { %s3158_s22 = sadd.s32 4294967295, %s3051_s21   ;;  %s2580_s23 = sadd.s32 4294967294, %s3051_s21   ;;  %s3051_s21 = sphi %s3143_s21, %s5535_s21   ;;  %s3047_s20 = sphi %s3141_s20, %s5534_s20   ;;  %s3043_s19 = sphi %s3139_s19, %s5533_s19   ;;  %s3039_s18 = sphi %s3137_s18, %s5532_s18  }
   0x9   : > { %s3162_s24 = sadd.s32 1, %s3051_s21   ;;  %s360_s25 = sadd.s32 1, %s3047_s20 }
   0xa   : > { %s357_s26 = ssub.s32 %s3051_s21, %s3162_s24  ;;  %p370_p0 = scmp.ne.s32.totalorder %s3047_s20, %s3043_s19 }
   0xb   : > { %p358_p1 = scmp.eq.s32.totalorder %s357_s26, 0  ;;  %p371_p2 = scmp.eq.s32.totalorder %s3158_s22, 1 }
   0xc   : > { %p376_p3 = scmp.ne.s32.totalorder %s3043_s19, %s3039_s18  ;;  %p377_p4 = scmp.eq.s32.totalorder %s2580_s23, 1 }
   0xd   : > { %s3173_s27 = scalar_select %p358_p1, %s3047_s20, %s360_s25  }
   0xe   : > { %p3175_p5 = por %p371_p2, %p370_p0  ;;  %p3179_p6 = por %p377_p4, %p376_p3 }
   0xf   : > { %5124 = sst [smem:[#allocation5_spill]] %s3173_s27  ;;  %p2583_p7 = scmp.ge.s32.totalorder %s3051_s21, 1 }
  0x10   : > { %p450_p8 = scmp.lt.s32.totalorder %s3051_s21, 3 }
  0x12   : > { %p451_p9 = pnand %p2583_p7, %p450_p8 }
  0x14   : > { %454 = sbr.rel (%p451_p9) target bundleno = 2288 (0x8f0), region = 80 }
  0x19   : > { %p502_p10 = scmp.lt.s32.totalorder %s3158_s22, 1  ;;  %s5127_s3 = sld [smem:[#allocation21_spill]]  ;;  %v5087_v1 = vmov 0.0   ;;  %vm5074_vm0 = vmmov 0   ;;  %vm5071_vm1 = vcmask 1043456   ;;  %vm5079_vm2 = vcmask 130048  }
  0x1a   : > { %2706 = vmatprep.subr.bf16.mxu0 %v5087_v1  ;;  %2708 = vmatprep.mubr.msk.bf16.mxu0 %vm5074_vm0, %v5087_v1  ;;  %s5128_s0 = sld [smem:[#allocation18_spill]]  ;;  %vm5070_vm3 = vcmask 64512   ;;  %v701_v7 = vlaneseq  ;;  %v3055_v8 = vmov 0   ;;  %v2593_v48 = vld [vmem:[%s5058_s4] ss:$0 sm:$0xff]  ;;  %vm5076_vm6 = vcmask 261120  }
  0x1b   : > { %s503_s17 = scalar_select %p502_p10, %s3158_s22, 1  ;;  %2712 = vmatprep.subr.bf16.mxu1 %v5087_v1  ;;  %2714 = vmatprep.mubr.msk.bf16.mxu1 %vm5074_vm0, %v5087_v1  ;;  %v2594_v53 = vld [vmem:[%s5059_s5] ss:$0 sm:$0xff] }
  0x1c   : > { %s5129_s1 = sld [smem:[#allocation19_spill]]  ;;  %2816 = vset.pattern.permute.xlu0 %v3055_v8  ;;  %2810 = vset.pattern.permute.xlu1 %v3055_v8  ;;  %v3219_v9 = vshrl.u32 %v701_v7, 7  ;;  %v3221_v10 = vand.u32 127, %v701_v7  ;;  %s3056_s25 = smov [#allocation2]  }
  0x1d   : > { %s2682_s23 = sshll.u32 %s503_s17, 3  ;;  %s5130_s2 = sld [smem:[#allocation20_spill]] }
  0x1e   : > { %vm706_vm4 = vcmp.lt.s32.totalorder %v3221_v10, %v3219_v9  ;;  %v3226_v11 = vsub.s32 1, %v3219_v9  ;;  %v3231_v13 = vsub.s32 2, %v3219_v9  ;;  %v703_v14 = vadd.s32 8, %v3219_v9 }
  0x1f   : > { %v575_v0 = vld [vmem:[%s5127_s3] sm:$0xf]  ;;  %v3228_v12 = vsel %vm706_vm4, 1, %v3055_v8  ;;  %v3240_v17 = vsub.s32 0, %v3219_v9  ;;  %v3246_v21 = vsub.s32 3, %v3219_v9  ;;  %v3252_v24 = vsub.s32 4, %v3219_v9 }
  0x20   : > { %v582_v2 = vsel %vm5071_vm1, %v575_v0, 0  ;;  %s3201_s30 = scalar_lea.vmem %s5128_s0, %s2682_s23  ;;  %v870_v15 = vrot.slane %v3228_v12, %v3226_v11  ;;  %vm707_vm5 = vcmp.lt.s32.totalorder %v3221_v10, %v703_v14  ;;  %v881_v16 = vrot.slane %v3228_v12, %v3231_v13  ;;  %s2679_s3 = sshll.u32 %s3158_s22, 4 }
  0x21   : > { %2713 = vmatpush3.bf16.msra.mxu1 %v582_v2  ;;  %v2973_v4 = vld [vmem:[%s3201_s30] sm:$0xff]   ;;  %v855_v18 = vsel %vm707_vm5, 1, %v3055_v8  ;;  %v859_v19 = vrot.slane %v3228_v12, %v3240_v17  ;;  %v892_v22 = vrot.slane %v3228_v12, %v3246_v21  ;;  %v903_v26 = vrot.slane %v3228_v12, %v3252_v24  ;;  %s5013_s0 = scalar_lea.hbm %s5069_s15, %s2679_s3 }
  0x22   : > { %2724 = vmatprep.subr.bf16.mxu1 %v5087_v1  ;;  %s511_s27 = scalar_lea.vmem %s5129_s1, %s2682_s23  ;;  %872 = vbcast.lane.b32.xlu0 %v870_v15, 256  ;;  %v969_v20 = vrot.slane %v855_v18, %v3231_v13  ;;  %v980_v23 = vrot.slane %v855_v18, %v3246_v21  ;;  %v947_v25 = vrot.slane %v855_v18, %v3240_v17  ;;  %v3259_v28 = vsub.s32 5, %v3219_v9  ;;  %s2995_s1 = sshll.u32 %s3056_s25, 4  ;;  %s2996_s1 = int_to_ptr.vmem [resolvable:$false] %s2995_s1 }
  0x23   : > { %v2972_v3 = vld [vmem:[%s511_s27] sm:$0xff]   ;;  %861 = vbcast.lane.b32.xlu1 %v859_v19, 256  ;;  %v991_v27 = vrot.slane %v855_v18, %v3252_v24  ;;  %v3265_v31 = vsub.s32 6, %v3219_v9  ;;  %v958_v42 = vrot.slane %v855_v18, %v3226_v11  ;;  %v3275_v44 = vsub.s32 7, %v3219_v9  ;;  %s2997_s26 = scalar_lea.vmem %s2996_s1, 32 }
  0x24   : > { %2707 = vmatpush3.bf16.msra.mxu0 %v2972_v3  ;;  %2715 = vmatmul.mubr.msk.bf16.vlgmr.msra.gmra.mxu1 %vm5070_vm3, %v2972_v3  ;;  %v574_v5 = vld [vmem:[%s5130_s2] sm:$0xf]  ;;  %v914_v29 = vrot.slane %v3228_v12, %v3259_v28  ;;  %v1002_v30 = vrot.slane %v855_v18, %v3259_v28 }
  0x25   : > { %2718 = vmatprep.subr.bf16.mxu0 %v5087_v1  ;;  %2726 = vmatprep.mubr.msk.bf16.mxu1 %vm5074_vm0, %v5087_v1  ;;  %v629_v6 = vsel %vm5071_vm1, %v574_v5, 0  ;;  %v925_v32 = vrot.slane %v3228_v12, %v3265_v31  ;;  %v1013_v33 = vrot.slane %v855_v18, %v3265_v31  ;;  %v936_v45 = vrot.slane %v3228_v12, %v3275_v44 }
  0x26   : > { %887 = vbcast.lane.b32.xlu0 %v881_v16, 264  ;;  %v1024_v46 = vrot.slane %v855_v18, %v3275_v44 }
  0x27   : > { %2709 = vmatmul.mubr.msk.bf16.vlgmr.msra.gmra.mxu0 %vm5079_vm2, %v2973_v4  ;;  %865 = vbcast.lane.b32.xlu1 %v859_v19, 264 }
  0x28   : > { %2720 = vmatprep.mubr.msk.bf16.mxu0 %vm5074_vm0, %v5087_v1  ;;  %2719 = vmatpush3.bf16.msra.mxu0 %v629_v6 }
  0x29   : > { %2730 = vmatprep.subr.bf16.mxu0 %v5087_v1 }
  0x2a   : > { %975 = vbcast.lane.b32.xlu0 %v969_v20, 264 }
  0x2b   : > { %876 = vbcast.lane.b32.xlu1 %v870_v15, 264 }
  0x2e   : > { %898 = vbcast.lane.b32.xlu0 %v892_v22, 264 }
  0x2f   : > { %949 = vbcast.lane.b32.xlu1 %v947_v25, 256 }
  0x32   : > { %986 = vbcast.lane.b32.xlu0 %v980_v23, 264 }
  0x33   : > { %953 = vbcast.lane.b32.xlu1 %v947_v25, 264 }
  0x36   : > { %909 = vbcast.lane.b32.xlu0 %v903_v26, 264 }
  0x37   : > { %960 = vbcast.lane.b32.xlu1 %v958_v42, 256 }
  0x3a   : > { %997 = vbcast.lane.b32.xlu0 %v991_v27, 264 }
  0x3b   : > { %964 = vbcast.lane.b32.xlu1 %v958_v42, 264 }
  0x3e   : > { %920 = vbcast.lane.b32.xlu0 %v914_v29, 264 }
  0x3f   : > { %883 = vbcast.lane.b32.xlu1 %v881_v16, 256 }
  0x42   : > { %1008 = vbcast.lane.b32.xlu0 %v1002_v30, 264 }
  0x43   : > { %971 = vbcast.lane.b32.xlu1 %v969_v20, 256 }
  0x46   : > { %931 = vbcast.lane.b32.xlu0 %v925_v32, 264 }
  0x47   : > { %894 = vbcast.lane.b32.xlu1 %v892_v22, 256 }
  0x4a   : > { %1019 = vbcast.lane.b32.xlu0 %v1013_v33, 264 }
  0x4b   : > { %982 = vbcast.lane.b32.xlu1 %v980_v23, 256 }
  0x4f   : > { %905 = vbcast.lane.b32.xlu1 %v903_v26, 256 }
  0x53   : > { %993 = vbcast.lane.b32.xlu1 %v991_v27, 256 }
  0x57   : > { %916 = vbcast.lane.b32.xlu1 %v914_v29, 256 }
  0x5b   : > { %1004 = vbcast.lane.b32.xlu1 %v1002_v30, 256 }
  0x5f   : > { %927 = vbcast.lane.b32.xlu1 %v925_v32, 256 }
  0x63   : > { %1015 = vbcast.lane.b32.xlu1 %v1013_v33, 256 }
  0x67   : > { %938 = vbcast.lane.b32.xlu1 %v936_v45, 256 }
  0x6b   : > { %1026 = vbcast.lane.b32.xlu1 %v1024_v46, 256 }
  0x94   : > { %v3298_v63 = vpop.permute.xlu0 %872 }
  0x95   : > { %v3302_v2 = vpop.permute.xlu1 %861  ;;  %vm5073_vm11 = vcmp.ne.s32.totalorder %v3298_v63, 0 }
  0x96   : > { %vm5072_vm9 = vcmp.ne.s32.totalorder %v3302_v2, 0 }
  0x98   : > { %v3300_v0 = vpop.permute.xlu0 %887 }
  0x99   : > { %v3306_v4 = vpop.permute.xlu1 %865 }
  0x9c   : > { %v3304_v3 = vpop.permute.xlu0 %975 }
  0x9d   : > { %v3310_v6 = vpop.permute.xlu1 %876 }
  0xa0   : > { %v3308_v5 = vpop.permute.xlu0 %898 }
  0xa1   : > { %v3314_v8 = vpop.permute.xlu1 %949  ;;  %vm5156_vm2 = vcmp.ne.s32.totalorder %v3308_v5, 0 }
  0xa2   : > { %5131 = vst [vmem:[#allocation6_spill] sm:$0xff] %v3314_v8 }
  0xa4   : > { %v3312_v7 = vpop.permute.xlu0 %986 }
  0xa5   : > { %v3318_v14 = vpop.permute.xlu1 %953 }
  0xa6   : > { %5133 = vst [vmem:[#allocation8_spill] sm:$0xff] %v3318_v14 }
  0xa8   : > { %v3316_v12 = vpop.permute.xlu0 %909 }
  0xa9   : > { %5132 = vst [vmem:[#allocation7_spill] sm:$0xff] %v3316_v12  ;;  %v3322_v16 = vpop.permute.xlu1 %960 }
  0xaa   : > { %5135 = vst [vmem:[#allocation10_spill] sm:$0xff] %v3322_v16 }
  0xac   : > { %v3320_v15 = vpop.permute.xlu0 %997 }
  0xad   : > { %5134 = vst [vmem:[#allocation9_spill] sm:$0xff] %v3320_v15  ;;  %v3326_v19 = vpop.permute.xlu1 %964 }
  0xae   : > { %5137 = vst [vmem:[#allocation12_spill] sm:$0xff] %v3326_v19 }
  0xb0   : > { %v3324_v18 = vpop.permute.xlu0 %920 }
  0xb1   : > { %5136 = vst [vmem:[#allocation11_spill] sm:$0xff] %v3324_v18  ;;  %v3330_v22 = vpop.permute.xlu1 %883 }
  0xb2   : > { %vm5077_vm14 = vcmp.ne.s32.totalorder %v3330_v22, 0 }
  0xb4   : > { %v3328_v20 = vpop.permute.xlu0 %1008 }
  0xb5   : > { %v3334_v25 = vpop.permute.xlu1 %971 }
  0xb8   : > { %v3332_v23 = vpop.permute.xlu0 %931 }
  0xb9   : > { %v3338_v27 = vpop.permute.xlu1 %894 }
  0xba   : > { %vm5078_vm15 = vcmp.ne.s32.totalorder %v3338_v27, 0 }
  0xbc   : > { %v3336_v26 = vpop.permute.xlu0 %1019 }
  0xbd   : > { %5138 = vst [vmem:[#allocation13_spill] sm:$0xff] %v3336_v26  ;;  %v3340_v30 = vpop.permute.xlu1 %982 }
  0xc1   : > { %v3342_v33 = vpop.permute.xlu1 %905 }
  0xe4   : > { %v618_v39 = vpop.f32.mrf.mxu1 }
  0xe6   : > { %v2716_v40 = vpop.f32.mrf.mxu1 }
  0xe7   : > { %v566_v34 = vpop.f32.mrf.mxu0 }
  0xe8   : > { %v621_v41 = vpop.f32.mrf.mxu1 }
  0xe9   : > { %v2710_v35 = vpop.f32.mrf.mxu0 }
  0xea   : > { %v2717_v43 = vpop.f32.mrf.mxu1  ;;  %v3346_v35 = vpop.permute.xlu1 %993 }
  0xeb   : > { %v569_v36 = vpop.f32.mrf.mxu0 }
  0xec   : > { %v573_v37 = vpack.c.bf16 %v569_v36, %v566_v34 }
  0xed   : > { %v2711_v38 = vpop.f32.mrf.mxu0 }
  0xee   : > { %2721 = vmatmul.mubr.msk.bf16.vlgmr.msra.gmra.mxu0 %vm5070_vm3, %v573_v37  ;;  %v3364_v40 = vpop.permute.xlu1 %916  ;;  %vm5081_vm3 = vcmp.ne.s32.totalorder %v3342_v33, 0 }
  0xef   : > { %2734 = vmatprep.mubr.msk.bf16.mxu0 %vm5074_vm0, %v5087_v1  ;;  %5139 = vst [vmem:[#allocation14_spill] sm:$0xff] %v3364_v40  ;;  %v5233_v1 = vmov 0 }
 0x1ae   : > { %v665_v47 = vpop.f32.mrf.mxu0 }
 0x1af   : > { %v666_v49 = vadd.f32 %v665_v47, %v618_v39 }
 0x1b0   : > { %v2722_v50 = vpop.f32.mrf.mxu0 }
 0x1b1   : > { %v3283_v51 = vadd.f32 %v2593_v48, %v666_v49 }
 0x1b2   : > { %v668_v52 = vpop.f32.mrf.mxu0 }
 0x1b3   : > { %v5085_v54 = vmax.f32 %v3283_v51, 0.0  ;;  %v669_v55 = vadd.f32 %v668_v52, %v621_v41 }
 0x1b4   : > { %v2723_v56 = vpop.f32.mrf.mxu0 }
 0x1b5   : > { %v3289_v57 = vadd.f32 %v2593_v48, %v669_v55  ;;  %v690_v58 = vmul.f32 %v2594_v53, %v5085_v54  ;;  %v3414_v48 = vpop.permute.xlu1 %1004  ;;  %v5150_v55 = vmov 0  ;;  %v5229_v56 = vmov 0 }
 0x1b7   : > { %v5084_v59 = vmax.f32 %v3289_v57, 0.0  ;;  %v693_v60 = vsel %vm5076_vm6, %v690_v58, 0.0 }
 0x1b8   : > { %694 = vadd.xlane.f32.xlu0 %v693_v60  ;;  %v5154_v60 = vmov 0 }
 0x1b9   : > { %v691_v61 = vmul.f32 %v2594_v53, %v5084_v59  ;;  %v3522_v43 = vpop.permute.xlu1 %927  ;;  %v5167_v59 = vmov 0 }
 0x1ba   : > { %5165 = vst [vmem:[#allocation15_spill] sm:$0xff] %v3522_v43 }
 0x1bb   : > { %v696_v62 = vsel %vm5076_vm6, %v691_v61, 0.0  ;;  %vm5083_vm6 = vcmp.ne.s32.totalorder %v3300_v0, 0 }
 0x1bc   : > { %697 = vadd.xlane.f32.xlu0 %v696_v62 }
 0x1d2   : > { %942 = vbcast.lane.b32.xlu0 %v936_v45, 264  ;;  %v5173_v45 = vmov 0 }
 0x1d6   : > { %1030 = vbcast.lane.b32.xlu0 %v1024_v46, 264 }
 0x241   : > { %v695_v29 = vpop.xlane.xlu0 %694 }
 0x242   : > { %2982 = vtanh.f32 %v695_v29 }
 0x245   : > { %v698_v32 = vpop.xlane.xlu0 %697 }
 0x246   : > { %2984 = vtanh.f32 %v698_v32 }
 0x24f   : > { %v3344_v34 = vpop.eup %2982 }
 0x250   : > { %v3350_v36 = vrot.slane %v3344_v34, %v3240_v17  ;;  %v3354_v37 = vrot.slane %v3344_v34, %v3226_v11  ;;  %v3358_v38 = vrot.slane %v3344_v34, %v3231_v13  ;;  %v3362_v39 = vrot.slane %v3344_v34, %v3246_v21 }
 0x251   : > { %v3372_v42 = vrot.slane %v3344_v34, %v3252_v24  ;;  %v3401_v46 = vrot.slane %v3344_v34, %v3259_v28  ;;  %v3445_v53 = vrot.slane %v3344_v34, %v3265_v31 }
 0x252   : > { %vm822_vm7 = vcmp.eq.f32.partialorder %v3344_v34, %v3350_v36  ;;  %vm824_vm8 = vcmp.eq.f32.partialorder %v3344_v34, %v3354_v37  ;;  %vm826_vm10 = vcmp.eq.f32.partialorder %v3344_v34, %v3358_v38  ;;  %vm828_vm12 = vcmp.eq.f32.partialorder %v3344_v34, %v3362_v39 }
 0x253   : > { %v3368_v41 = vpop.eup %2984  ;;  %vm3384_vm13 = vmand %vm822_vm7, %vm5072_vm9  ;;  %vm830_vm7 = vcmp.eq.f32.partialorder %v3344_v34, %v3372_v42 }
 0x254   : > { %vm823_vm4 = vcmp.eq.f32.partialorder %v3368_v41, %v3350_v36  ;;  %vm3394_vm5 = vmand %vm824_vm8, %vm5073_vm11  ;;  %vm825_vm1 = vcmp.eq.f32.partialorder %v3368_v41, %v3354_v37  ;;  %vm5080_vm8 = vcmp.ne.s32.totalorder %v3306_v4, 0  ;;  %vm827_vm11 = vcmp.eq.f32.partialorder %v3368_v41, %v3358_v38 }
 0x255   : > { %vm3409_vm9 = vmand %vm826_vm10, %vm5077_vm14  ;;  %vm5082_vm10 = vcmp.ne.s32.totalorder %v3310_v6, 0  ;;  %v3428_v50 = vrot.slane %v3368_v41, %v3240_v17  ;;  %vm790_vm14 = vcmp.gt.f32.partialorder %v3344_v34, %v3350_v36  ;;  %v3473_v58 = vrot.slane %v3368_v41, %v3226_v11 }
 0x256   : > { %vm3420_vm0 = vmand %vm828_vm12, %vm5078_vm15  ;;  %vm832_vm15 = vcmp.eq.f32.partialorder %v3344_v34, %v3401_v46  ;;  %v3514_v29 = vrot.slane %v3368_v41, %v3231_v13  ;;  %v3614_v49 = vrot.slane %v3368_v41, %v3252_v24  ;;  %v3761_v61 = vrot.slane %v3368_v41, %v3259_v28 }
 0x257   : > { %vm3437_vm12 = vmand %vm823_vm4, %vm5080_vm8 }
 0x258   : > { %vm3454_vm4 = vmand %vm830_vm7, %vm5081_vm3  ;;  %vm5157_vm7 = vcmp.eq.f32.partialorder %v3368_v41, %v3362_v39 }
 0x259   : > { %v5151_v55 = vsel %vm3454_vm4, 4294967295, %v5150_v55  ;;  %vm3463_vm8 = vmand %vm825_vm1, %vm5082_vm10  ;;  %vm5089_vm10 = vcmp.ne.s32.totalorder %v3324_v18, 0  ;;  %v3587_v18 = vrot.slane %v3368_v41, %v3246_v21 }
 0x25a   : > { %vm3482_vm1 = vmand %vm827_vm11, %vm5083_vm6  ;;  %vm5086_vm11 = vcmp.ne.s32.totalorder %v3316_v12, 0 }
 0x25b   : > { %v5155_v60 = vsel %vm3482_vm1, 4294967295, %v5154_v60  ;;  %vm3495_vm4 = vmand %vm5157_vm7, %vm5156_vm2  ;;  %vm5162_vm7 = vcmp.ne.s32.totalorder %v3364_v40, 0  ;;  %v5186_v40 = vmov 0  ;;  %vm5193_vm1 = vcmp.eq.f32.partialorder %v3344_v34, %v3473_v58 }
 0x25c   : > { %vm3505_vm3 = vmor %vm790_vm14, %vm3384_vm13  ;;  %vm5166_vm14 = vcmp.eq.f32.partialorder %v3368_v41, %v3372_v42 }
 0x25d   : > { %vm3518_vm6 = vmand %vm832_vm15, %vm5162_vm7  ;;  %vm5169_vm15 = vcmp.gt.f32.partialorder %v3344_v34, %v3354_v37 }
 0x25e   : > { %vm3531_vm2 = vmand %vm5166_vm14, %vm5086_vm11  ;;  %vm5094_vm11 = vcmp.ne.s32.totalorder %v3318_v14, 0  ;;  %vm5179_vm14 = vcmp.eq.f32.partialorder %v3344_v34, %v3428_v50  ;;  %v5190_v14 = vmov 0 }
 0x25f   : > { %v5168_v59 = vsel %vm3531_vm2, 4294967295, %v5167_v59  ;;  %vm3540_vm7 = vmor %vm5169_vm15, %vm3394_vm5  ;;  %vm5172_vm2 = vcmp.eq.f32.partialorder %v3368_v41, %v3401_v46  ;;  %vm5175_vm15 = vcmp.gt.f32.partialorder %v3344_v34, %v3358_v38 }
 0x260   : > { %vm3556_vm5 = vmand %vm5172_vm2, %vm5089_vm10  ;;  %vm5178_vm10 = vcmp.ne.s32.totalorder %v3314_v8, 0  ;;  %vm5182_vm2 = vcmp.gt.f32.partialorder %v3344_v34, %v3362_v39  ;;  %v5183_v8 = vmov 0 }
 0x261   : > { %v5174_v45 = vsel %vm3556_vm5, 4294967295, %v5173_v45  ;;  %vm3565_vm13 = vmor %vm5175_vm15, %vm3409_vm9 }
 0x262   : > { %vm3579_vm5 = vmand %vm5179_vm14, %vm5178_vm10  ;;  %vm5185_vm14 = vcmp.eq.f32.partialorder %v3368_v41, %v3428_v50 }
 0x263   : > { %vm3596_vm10 = vmor %vm5182_vm2, %vm3420_vm0  ;;  %vm5188_vm0 = vcmp.ne.s32.totalorder %v3522_v43, 0  ;;  %vm5189_vm2 = vcmp.eq.f32.partialorder %v3344_v34, %v3445_v53 }
 0x264   : > { %v5184_v8 = vsel %vm3596_vm10, 4294967295, %v5183_v8  ;;  %vm3605_vm15 = vmand %vm5185_vm14, %vm5094_vm11  ;;  %vm5192_vm11 = vcmp.ne.s32.totalorder %v3322_v16, 0 }
 0x265   : > { %v5187_v40 = vsel %vm3605_vm15, 4294967295, %v5186_v40  ;;  %vm3621_vm10 = vmand %vm5189_vm2, %vm5188_vm0  ;;  %vm5196_vm0 = vcmp.gt.f32.partialorder %v3368_v41, %v3350_v36  ;;  %vm5197_vm15 = vcmp.ne.s32.totalorder %v3326_v19, 0  ;;  %v5202_v36 = vmov 0.0  }
 0x266   : > { %v5191_v14 = vsel %vm3621_vm10, 4294967295, %v5190_v14  ;;  %vm3632_vm9 = vmand %vm5193_vm1, %vm5192_vm11  ;;  %vm5198_vm1 = vcmp.eq.f32.partialorder %v3368_v41, %v3473_v58  ;;  %v2595_v52 = vsel %vm3505_vm3, 1.0, %v5202_v36 }
 0x267   : > { %vm1097_vm2 = vmor %vm5196_vm0, %vm3437_vm12  ;;  %vm5201_vm12 = vcmp.gt.f32.partialorder %v3368_v41, %v3354_v37  ;;  %v2597_v37 = vsel %vm3540_vm7, 1.0, %v5202_v36  ;;  %vm5211_vm7 = vcmp.ne.s32.totalorder %v3334_v25, 0 }
 0x268   : > { %vm3650_vm11 = vmand %vm5198_vm1, %vm5197_vm15  ;;  %v2596_v43 = vsel %vm1097_vm2, 1.0, %v5202_v36  ;;  %vm5203_vm15 = vnez %v5155_v60  ;;  %vm5204_vm1 = vcmp.gt.f32.partialorder %v3368_v41, %v3358_v38  ;;  %v5209_v38 = vmov 0 }
 0x269   : > { %vm1099_vm0 = vmor %vm5201_vm12, %vm3463_vm8  ;;  %v2811_v19 = vpack.i.bf16 %v2596_v43, %v2595_v52  ;;  %vm5099_vm8 = vcmp.ne.s32.totalorder %v3332_v23, 0  ;;  %vm5207_vm12 = vnez %v5151_v55  ;;  %v5216_v55 = vmov 0  ;;  %v3715_v43 = vpop.permute.xlu1 %1015 }
 0x26a   : > { %vm3670_vm10 = vmor %vm5204_vm1, %vm5203_vm15  ;;  %v2598_v62 = vsel %vm1099_vm0, 1.0, %v5202_v36  ;;  %vm5208_vm15 = vcmp.gt.f32.partialorder %v3344_v34, %v3372_v42  ;;  %vm5212_vm0 = vcmp.eq.f32.partialorder %v3344_v34, %v3514_v29 }
 0x26b   : > { %vm3687_vm1 = vmor %vm5208_vm15, %vm5207_vm12  ;;  %v2817_v60 = vpack.i.bf16 %v2598_v62, %v2597_v37  ;;  %vm5215_vm15 = vcmp.eq.f32.partialorder %v3368_v41, %v3445_v53  ;;  %v2600_v37 = vsel %vm3670_vm10, 1.0, %v5202_v36  ;;  %2812 = vperm.xlu1 %2810, %v2811_v19   ;;  %vm5225_vm12 = vcmp.eq.f32.partialorder %v3344_v34, %v3587_v18 }
 0x26c   : > { %v5210_v38 = vsel %vm3687_vm1, 4294967295, %v5209_v38  ;;  %vm3696_vm14 = vmand %vm5212_vm0, %vm5211_vm7  ;;  %vm5218_vm7 = vcmp.ne.s32.totalorder %v3304_v3, 0  ;;  %vm5219_vm0 = vcmp.eq.f32.partialorder %v3368_v41, %v3514_v29  ;;  %v5250_v62 = vmov 0 }
 0x26d   : > { %vm3711_vm1 = vmand %vm5215_vm15, %vm5099_vm8  ;;  %vm5100_vm8 = vcmp.ne.s32.totalorder %v3340_v30, 0  ;;  %2818 = vperm.xlu0 %2816, %v2817_v60   ;;  %vm5232_vm15 = vcmp.eq.f32.partialorder %v3368_v41, %v3587_v18 }
 0x26e   : > { %v5217_v55 = vsel %vm3711_vm1, 4294967295, %v5216_v55  ;;  %vm3722_vm3 = vmand %vm5219_vm0, %vm5218_vm7  ;;  %vm5222_vm7 = vcmp.gt.f32.partialorder %v3368_v41, %v3362_v39  ;;  %v2599_v39 = vsel %vm3565_vm13, 1.0, %v5202_v36  ;;  %vm5231_vm13 = vcmp.ne.s32.totalorder %v3312_v7, 0 }
 0x26f   : > { %vm3738_vm0 = vmor %vm5222_vm7, %vm3495_vm4  ;;  %vm5235_vm4 = vnez %v5168_v59  ;;  %vm5236_vm7 = vcmp.gt.f32.partialorder %v3368_v41, %v3372_v42  ;;  %v2822_v60 = vpack.i.bf16 %v2600_v37, %v2599_v39  ;;  %v3835_v37 = vrot.slane %v3368_v41, %v3265_v31  ;;  %v3851_v39 = vpop.permute.xlu1 %938 }
 0x270   : > { %vm3752_vm1 = vmand %vm5225_vm12, %vm5100_vm8  ;;  %vm5228_vm12 = vcmp.gt.f32.partialorder %v3344_v34, %v3401_v46  ;;  %v2602_v42 = vsel %vm3738_vm0, 1.0, %v5202_v36  ;;  %vm5247_vm0 = vcmp.gt.f32.partialorder %v3344_v34, %v3428_v50 }
 0x271   : > { %vm3772_vm8 = vmor %vm5228_vm12, %vm3518_vm6  ;;  %vm5243_vm12 = vcmp.ne.s32.totalorder %v3346_v35, 0  ;;  %vm5244_vm6 = vcmp.eq.f32.partialorder %v3344_v34, %v3614_v49  ;;  %2823 = vperm.xlu0 %2816, %v2822_v60  }
 0x272   : > { %v5230_v56 = vsel %vm3772_vm8, 4294967295, %v5229_v56  ;;  %vm3781_vm2 = vmand %vm5232_vm15, %vm5231_vm13  ;;  %vm5239_vm13 = vnez %v5174_v45  ;;  %v3826_v45 = vrot.slane %v3344_v34, %v3275_v44 }
 0x273   : > { %v5234_v1 = vsel %vm3781_vm2, 4294967295, %v5233_v1  ;;  %vm3790_vm10 = vmor %vm5236_vm7, %vm5235_vm4  ;;  %vm5240_vm2 = vcmp.gt.f32.partialorder %v3368_v41, %v3401_v46  ;;  %v5245_v46 = vmov 0  ;;  %vm5249_vm4 = vcmp.eq.f32.partialorder %v3368_v41, %v3614_v49 }
 0x274   : > { %vm3804_vm8 = vmor %vm5240_vm2, %vm5239_vm13  ;;  %v2604_v12 = vsel %vm3790_vm10, 1.0, %v5202_v36  ;;  %vm5269_vm10 = vcmp.ne.s32.totalorder %v3328_v20, 0 }
 0x275   : > { %vm3820_vm2 = vmand %vm5244_vm6, %vm5243_vm12  ;;  %vm5248_vm12 = vcmp.ne.s32.totalorder %v3320_v15, 0  ;;  %vm5254_vm6 = vcmp.gt.f32.partialorder %v3368_v41, %v3428_v50 }
 0x276   : > { %v5246_v46 = vsel %vm3820_vm2, 4294967295, %v5245_v46  ;;  %vm1112_vm13 = vmor %vm5247_vm0, %vm3579_vm5  ;;  %vm5252_vm5 = vnez %v5184_v8  ;;  %vm5253_vm0 = vnez %v5187_v40  ;;  %vm5255_vm2 = vnez %v5191_v14 }
 0x277   : > { %vm3844_vm7 = vmand %vm5249_vm4, %vm5248_vm12  ;;  %v2601_v47 = vsel %vm5252_vm5, 1.0, %v5202_v36  ;;  %v2611_v60 = vsel %vm1112_vm13, 1.0, %v5202_v36  ;;  %vm5256_vm4 = vcmp.gt.f32.partialorder %v3344_v34, %v3445_v53  ;;  %vm5259_vm13 = vcmp.gt.f32.partialorder %v3344_v34, %v3473_v58 }
 0x278   : > { %v5251_v62 = vsel %vm3844_vm7, 4294967295, %v5250_v62  ;;  %vm1113_vm15 = vmor %vm5254_vm6, %vm5253_vm0  ;;  %vm848_vm7 = vcmp.eq.f32.partialorder %v3344_v34, %v3761_v61  ;;  %v2827_v14 = vpack.i.bf16 %v2602_v42, %v2601_v47  ;;  %vm849_vm0 = vcmp.eq.f32.partialorder %v3368_v41, %v3761_v61 }
 0x279   : > { %vm3864_vm12 = vmor %vm5256_vm4, %vm5255_vm2  ;;  %v2612_v8 = vsel %vm1113_vm15, 1.0, %v5202_v36  ;;  %vm5260_vm4 = vcmp.gt.f32.partialorder %v3368_v41, %v3473_v58  ;;  %vm5102_vm15 = vcmp.ne.s32.totalorder %v3851_v39, 0 }
 0x27a   : > { %vm1114_vm6 = vmor %vm5259_vm13, %vm3632_vm9  ;;  %v2852_v40 = vpack.i.bf16 %v2612_v8, %v2611_v60  ;;  %vm5261_vm13 = vcmp.gt.f32.partialorder %v3344_v34, %v3514_v29  ;;  %2828 = vperm.xlu0 %2816, %v2827_v14   ;;  %vm5264_vm9 = vcmp.ne.s32.totalorder %v3414_v48, 0  ;;  %v3990_v8 = vpop.permute.xlu0 %942 }
 0x27b   : > { %vm1115_vm5 = vmor %vm5260_vm4, %vm3650_vm11  ;;  %v2613_v50 = vsel %vm1114_vm6, 1.0, %v5202_v36  ;;  %vm5268_vm6 = vcmp.gt.f32.partialorder %v3368_v41, %v3514_v29  ;;  %vm813_vm11 = vcmp.gt.f32.partialorder %v3368_v41, %v3587_v18 }
 0x27c   : > { %vm3898_vm2 = vmor %vm5261_vm13, %vm3696_vm14  ;;  %v2614_v58 = vsel %vm1115_vm5, 1.0, %v5202_v36  ;;  %vm5267_vm5 = vnez %v5210_v38  ;;  %2853 = vperm.xlu1 %2810, %v2852_v40  }
 0x27d   : > { %vm3914_vm14 = vmand %vm848_vm7, %vm5264_vm9  ;;  %v2603_v32 = vsel %vm5267_vm5, 1.0, %v5202_v36  ;;  %vm5272_vm9 = vnez %v5217_v55  ;;  %vm5273_vm5 = vcmp.gt.f32.partialorder %v3368_v41, %v3445_v53  ;;  %v2606_v55 = vsel %vm3804_vm8, 1.0, %v5202_v36 }
 0x27e   : > { %vm1117_vm13 = vmor %vm5268_vm6, %vm3722_vm3  ;;  %v2832_v38 = vpack.i.bf16 %v2604_v12, %v2603_v32  ;;  %v2857_v52 = vpack.i.bf16 %v2614_v58, %v2613_v50  ;;  %v5279_v53 = vmov 0  ;;  %v2615_v47 = vsel %vm3898_vm2, 1.0, %v5202_v36  ;;  %v4047_v58 = vpop.permute.xlu1 %1026 }
 0x27f   : > { %vm3933_vm7 = vmand %vm849_vm0, %vm5269_vm10  ;;  %vm5276_vm0 = vcmp.eq.f32.partialorder %v3344_v34, %v3826_v45  ;;  %v2616_v60 = vsel %vm1117_vm13, 1.0, %v5202_v36  ;;  %vm815_vm8 = vcmp.gt.f32.partialorder %v3368_v41, %v3614_v49  ;;  %vm5286_vm2 = vcmp.gt.f32.partialorder %v3344_v34, %v3826_v45  ;;  %5299 = vst [vmem:[#allocation16_spill] sm:$0xff] %v4047_v58 }
 0x280   : > { %vm3942_vm4 = vmor %vm5273_vm5, %vm5272_vm9  ;;  %vm5277_vm9 = vcmp.ne.s32.totalorder %v3715_v43, 0  ;;  %vm5278_vm5 = vcmp.eq.f32.partialorder %v3344_v34, %v3835_v37  ;;  %2833 = vperm.xlu0 %2816, %v2832_v38   ;;  %2858 = vperm.xlu1 %2810, %v2857_v52   ;;  %vm5289_vm6 = vnez %v5246_v46  ;;  %v2862_v12 = vpack.i.bf16 %v2616_v60, %v2615_v47  ;;  %v4063_v52 = vpop.permute.xlu0 %1030 }
 0x281   : > { %vm1078_vm10 = vmand %vm5276_vm0, %vm5102_vm15  ;;  %vm5281_vm0 = vcmp.gt.f32.partialorder %v3344_v34, %v3587_v18  ;;  %5302 = vst [vmem:[#allocation17_spill] sm:$0xff] %v4063_v52 }
 0x282   : > { %vm3963_vm3 = vmand %vm5278_vm5, %vm5277_vm9  ;;  %vm5284_vm9 = vnez %v5230_v56  ;;  %vm5285_vm5 = vnez %v5234_v1  ;;  %v2608_v1 = vsel %vm3942_vm4, 1.0, %v5202_v36  ;;  %vm816_vm4 = vcmp.gt.f32.partialorder %v3344_v34, %v3761_v61 }
 0x283   : > { %v5280_v53 = vsel %vm3963_vm3, 4294967295, %v5279_v53  ;;  %vm3972_vm15 = vmor %vm5281_vm0, %vm3752_vm1  ;;  %v2605_v19 = vsel %vm5284_vm9, 1.0, %v5202_v36  ;;  %vm837_vm0 = vcmp.eq.f32.partialorder %v3368_v41, %v3826_v45  ;;  %vm5293_vm9 = vnez %v5251_v62 }
 0x284   : > { %vm1119_vm1 = vmor %vm813_vm11, %vm5285_vm5  ;;  %v2837_v56 = vpack.i.bf16 %v2606_v55, %v2605_v19  ;;  %vm5290_vm11 = vcmp.gt.f32.partialorder %v3344_v34, %v3614_v49  ;;  %v2617_v49 = vsel %vm3972_vm15, 1.0, %v5202_v36  ;;  %2863 = vperm.xlu1 %2810, %v2862_v12   ;;  %v773_v62 = vrot.slane %v3368_v41, %v3275_v44 }
 0x285   : > { %vm3995_vm13 = vmor %vm5286_vm2, %vm1078_vm10  ;;  %vm805_vm10 = vcmp.gt.f32.partialorder %v3368_v41, %v3826_v45  ;;  %vm851_vm2 = vcmp.eq.f32.partialorder %v3368_v41, %v3835_v37  ;;  %v2618_v40 = vsel %vm1119_vm1, 1.0, %v5202_v36  ;;  %v2607_v45 = vsel %vm3864_vm12, 1.0, %v5202_v36 }
 0x286   : > { %vm4007_vm5 = vmor %vm5290_vm11, %vm5289_vm6  ;;  %2838 = vperm.xlu0 %2816, %v2837_v56   ;;  %vm5296_vm6 = vcmp.ne.s32.totalorder %v3990_v8, 0  ;;  %vm817_vm11 = vcmp.gt.f32.partialorder %v3368_v41, %v3761_v61  ;;  %v2842_v16 = vpack.i.bf16 %v2608_v1, %v2607_v45  ;;  %v2867_v32 = vpack.i.bf16 %v2618_v40, %v2617_v49 }
 0x287   : > { %vm4020_vm3 = vmor %vm815_vm8, %vm5293_vm9  ;;  %vm5118_vm9 = vcmp.ne.s32.totalorder %v3336_v26, 0  ;;  %vm818_vm1 = vcmp.gt.f32.partialorder %v3344_v34, %v3835_v37  ;;  %v2619_v38 = vsel %vm4007_vm5, 1.0, %v5202_v36  ;;  %v2609_v54 = vsel %vm3995_vm13, 1.0, %v5202_v36 }
 0x288   : > { %vm1079_vm8 = vmand %vm837_vm0, %vm5296_vm6  ;;  %v2620_v55 = vsel %vm4020_vm3, 1.0, %v5202_v36  ;;  %2868 = vperm.xlu1 %2810, %v2867_v32   ;;  %vm852_vm5 = vcmp.eq.f32.partialorder %v3344_v34, %v773_v62  ;;  %vm5117_vm3 = vcmp.ne.s32.totalorder %v4047_v58, 0  ;;  %vm853_vm6 = vcmp.eq.f32.partialorder %v3368_v41, %v773_v62 }
 0x289   : > { %vm1111_vm15 = vmor %vm805_vm10, %vm1079_vm8  ;;  %vm819_vm10 = vcmp.gt.f32.partialorder %v3368_v41, %v3835_v37  ;;  %vm5116_vm8 = vcmp.ne.s32.totalorder %v4063_v52, 0  ;;  %v2872_v37 = vpack.i.bf16 %v2620_v55, %v2619_v38  ;;  %v1324_v49 = vadd.s32 4294967288, %v3221_v10 }
 0x28a   : > { %vm4042_vm12 = vmand %vm851_vm2, %vm5118_vm9  ;;  %v2610_v50 = vsel %vm1111_vm15, 1.0, %v5202_v36  ;;  %2843 = vperm.xlu0 %2816, %v2842_v16   ;;  %vm5303_vm2 = vnez %v5280_v53  ;;  %vm821_vm15 = vcmp.gt.f32.partialorder %v3368_v41, %v773_v62 }
 0x28b   : > { %vm4053_vm0 = vmor %vm816_vm4, %vm3914_vm14  ;;  %v2847_v59 = vpack.i.bf16 %v2610_v50, %v2609_v54  ;;  %v4105_v16 = vsub.s32 %v1324_v49, %v3219_v9 }
 0x28c   : > { %vm1123_vm14 = vmor %vm817_vm11, %vm3933_vm7  ;;  %v2621_v61 = vsel %vm4053_vm0, 1.0, %v5202_v36  ;;  %vm820_vm7 = vcmp.gt.f32.partialorder %v3344_v34, %v773_v62  ;;  %2873 = vperm.xlu1 %2810, %v2872_v37   ;;  %v4102_v62 = vsub.s32 %v3221_v10, %v3219_v9 }
 0x28d   : > { %vm1124_vm4 = vmor %vm818_vm1, %vm5303_vm2  ;;  %v2622_v42 = vsel %vm1123_vm14, 1.0, %v5202_v36  ;;  %vm5114_vm14 = vcmask 1041409   ;;  %vm5111_vm2 = vcmask 1043459  }
 0x28e   : > { %vm1125_vm13 = vmor %vm819_vm10, %vm4042_vm12  ;;  %2848 = vperm.xlu0 %2816, %v2847_v59   ;;  %v2877_v53 = vpack.i.bf16 %v2622_v42, %v2621_v61  ;;  %v2623_v47 = vsel %vm1124_vm4, 1.0, %v5202_v36  ;;  %vm5115_vm10 = vcmask 130112   ;;  %vm5110_vm4 = vcmask 1044484  }
 0x28f   : > { %vm1094_vm11 = vmand %vm852_vm5, %vm5117_vm3  ;;  %v2624_v60 = vsel %vm1125_vm13, 1.0, %v5202_v36  ;;  %vm5113_vm5 = vcmask 1042434   ;;  %vm5107_vm13 = vcmask 1046534  }
 0x290   : > { %vm1095_vm1 = vmand %vm853_vm6, %vm5116_vm8  ;;  %2878 = vperm.xlu1 %2810, %v2877_v53   ;;  %v2882_v19 = vpack.i.bf16 %v2624_v60, %v2623_v47  ;;  %vm5109_vm6 = vcmask 1045509  }
 0x291   : > { %vm1126_vm12 = vmor %vm820_vm7, %vm1094_vm11  ;;  %vm5106_vm7 = vcmask 1047559   ;;  %vm5304_vm11 = vcmask 130048  }
 0x292   : > { %vm1127_vm0 = vmor %vm821_vm15, %vm1095_vm1  ;;  %v2625_v14 = vsel %vm1126_vm12, 1.0, %v5202_v36 }
 0x293   : > { %v2626_v56 = vsel %vm1127_vm0, 1.0, %v5202_v36  ;;  %vm5305_vm15 = vmmov %vm5304_vm11  ;;  %vm5308_vm0 = vcmask 261120  }
 0x294   : > { %2883 = vperm.xlu1 %2810, %v2882_v19   ;;  %v2887_v18 = vpack.i.bf16 %v2626_v56, %v2625_v14 }
 0x298   : > { %2888 = vperm.xlu1 %2810, %v2887_v18  }
 0x2e6   : > { %v2813_v12 = vpop.permute.xlu1 %2812 }
 0x2e7   : > { %v2815_v15 = vunpack.i.h.bf16 %v2813_v12  ;;  %v2814_v50 = vunpack.i.l.bf16 %v2813_v12 }
 0x2e8   : > { %v2819_v1 = vpop.permute.xlu0 %2818 }
 0x2e9   : > { %v2821_v32 = vunpack.i.h.bf16 %v2819_v1  ;;  %v2820_v29 = vunpack.i.l.bf16 %v2819_v1  ;;  %v1328_v37 = vrot.slane %v2815_v15, %v4105_v16  ;;  %v1323_v61 = vrot.slane %v2814_v50, %v4102_v62 }
 0x2eb   : > { %v1338_v10 = vrot.slane %v2821_v32, %v4105_v16  ;;  %v1334_v47 = vrot.slane %v2820_v29, %v4102_v62 }
 0x2ec   : > { %v2824_v46 = vpop.permute.xlu0 %2823 }
 0x2ed   : > { %v2826_v54 = vunpack.i.h.bf16 %v2824_v46  ;;  %v2825_v59 = vunpack.i.l.bf16 %v2824_v46  ;;  %v1339_v15 = vsel %vm5115_vm10, %v1338_v10, %v1334_v47 }
 0x2ef   : > { %v1347_v1 = vrot.slane %v2826_v54, %v4105_v16  ;;  %v1343_v12 = vrot.slane %v2825_v59, %v4102_v62 }
 0x2f5   : > { %v2829_v40 = vpop.permute.xlu0 %2828 }
 0x2f6   : > { %v2831_v42 = vunpack.i.h.bf16 %v2829_v40  ;;  %v2830_v53 = vunpack.i.l.bf16 %v2829_v40  ;;  %v1330_v40 = vsel %vm5115_vm10, %v1328_v37, %v1323_v61 }
 0x2f7   : > { %v4098_v45 = vpop.permute.xlu1 %2853  ;;  %v1467_v37 = vsel %vm5114_vm14, %v1339_v15, %v1330_v40 }
 0x2f8   : > { %v1356_v46 = vrot.slane %v2831_v42, %v4105_v16  ;;  %v1352_v49 = vrot.slane %v2830_v53, %v4102_v62  ;;  %v1348_v53 = vsel %vm5115_vm10, %v1347_v1, %v1343_v12 }
 0x2f9   : > { %v1469_v1 = vsel %vm5113_vm5, %v1348_v53, %v1467_v37 }
 0x2fa   : > { %v1357_v61 = vsel %vm5115_vm10, %v1356_v46, %v1352_v49 }
 0x2fb   : > { %v2834_v38 = vpop.permute.xlu0 %2833  ;;  %v2859_v55 = vpop.permute.xlu1 %2858 }
 0x2fc   : > { %v2836_v9 = vunpack.i.h.bf16 %v2834_v38  ;;  %v2835_v60 = vunpack.i.l.bf16 %v2834_v38  ;;  %v2861_v52 = vunpack.i.h.bf16 %v2859_v55 }
 0x2fe   : > { %v1365_v50 = vrot.slane %v2836_v9, %v4105_v16  ;;  %v1361_v32 = vrot.slane %v2835_v60, %v4102_v62  ;;  %v2856_v9 = vunpack.i.h.bf16 %v4098_v45  ;;  %v2855_v60 = vunpack.i.l.bf16 %v4098_v45 }
 0x2ff   : > { %v2864_v14 = vpop.permute.xlu1 %2863  ;;  %v1410_v46 = vrot.slane %v2861_v52, %v4105_v16 }
 0x300   : > { %v2866_v49 = vunpack.i.h.bf16 %v2864_v14 }
 0x301   : > { %v2839_v19 = vpop.permute.xlu0 %2838 }
 0x302   : > { %v2841_v56 = vunpack.i.h.bf16 %v2839_v19  ;;  %v2840_v18 = vunpack.i.l.bf16 %v2839_v19 }
 0x303   : > { %v2869_v38 = vpop.permute.xlu1 %2868 }
 0x304   : > { %v1374_v54 = vrot.slane %v2841_v56, %v4105_v16  ;;  %v1370_v59 = vrot.slane %v2840_v18, %v4102_v62  ;;  %v2860_v56 = vunpack.i.l.bf16 %v2859_v55  ;;  %v1366_v18 = vsel %vm5115_vm10, %v1365_v50, %v1361_v32 }
 0x305   : > { %v2844_v29 = vpop.permute.xlu0 %2843  ;;  %v2871_v53 = vunpack.i.h.bf16 %v2869_v38  ;;  %v2870_v37 = vunpack.i.l.bf16 %v2869_v38  ;;  %v1401_v38 = vrot.slane %v2856_v9, %v4105_v16 }
 0x306   : > { %v2846_v19 = vunpack.i.h.bf16 %v2844_v29  ;;  %v2845_v42 = vunpack.i.l.bf16 %v2844_v29  ;;  %v1375_v40 = vsel %vm5115_vm10, %v1374_v54, %v1370_v59  ;;  %v1406_v32 = vrot.slane %v2860_v56, %v4102_v62 }
 0x307   : > { %v2874_v12 = vpop.permute.xlu1 %2873 }
 0x308   : > { %v1383_v10 = vrot.slane %v2846_v19, %v4105_v16  ;;  %v1379_v47 = vrot.slane %v2845_v42, %v4102_v62  ;;  %v1471_v19 = vsel %vm5111_vm2, %v1357_v61, %v1469_v1  ;;  %v2865_v42 = vunpack.i.l.bf16 %v2864_v14 }
 0x309   : > { %v2849_v29 = vpop.permute.xlu0 %2848  ;;  %v1473_v50 = vsel %vm5110_vm4, %v1366_v18, %v1471_v19  ;;  %v2876_v59 = vunpack.i.h.bf16 %v2874_v12  ;;  %v2875_v52 = vunpack.i.l.bf16 %v2874_v12  ;;  %v1397_v1 = vrot.slane %v2855_v60, %v4102_v62 }
 0x30a   : > { %v2851_v58 = vunpack.i.h.bf16 %v2849_v29  ;;  %v2850_v26 = vunpack.i.l.bf16 %v2849_v29  ;;  %v1384_v15 = vsel %vm5115_vm10, %v1383_v10, %v1379_v47  ;;  %v1475_v54 = vsel %vm5109_vm6, %v1375_v40, %v1473_v50 }
 0x30b   : > { %v2879_v29 = vpop.permute.xlu1 %2878  ;;  %v1477_v61 = vsel %vm5107_vm13, %v1384_v15, %v1475_v54  ;;  %v1415_v18 = vrot.slane %v2865_v42, %v4102_v62  ;;  %v1428_v12 = vrot.slane %v2871_v53, %v4105_v16  ;;  %v1424_v40 = vrot.slane %v2870_v37, %v4102_v62 }
 0x30c   : > { %v1392_v45 = vrot.slane %v2851_v58, %v4105_v16  ;;  %v1388_v55 = vrot.slane %v2850_v26, %v4102_v62  ;;  %v2881_v14 = vunpack.i.h.bf16 %v2879_v29  ;;  %v2880_v47 = vunpack.i.l.bf16 %v2879_v29 }
 0x30d   : > { %v1419_v26 = vrot.slane %v2866_v49, %v4105_v16  ;;  %v1411_v15 = vsel %vm5115_vm10, %v1410_v46, %v1406_v32  ;;  %v1437_v19 = vrot.slane %v2876_v59, %v4105_v16  ;;  %v1402_v53 = vsel %vm5115_vm10, %v1401_v38, %v1397_v1 }
 0x30e   : > { %v1393_v10 = vsel %vm5115_vm10, %v1392_v45, %v1388_v55  ;;  %v1433_v45 = vrot.slane %v2875_v52, %v4102_v62  ;;  %v1446_v42 = vrot.slane %v2881_v14, %v4105_v16  ;;  %v1442_v55 = vrot.slane %v2880_v47, %v4102_v62 }
 0x30f   : > { %v1479_v58 = vsel %vm5106_vm7, %v1393_v10, %v1477_v61  ;;  %v2884_v49 = vpop.permute.xlu1 %2883  ;;  %v1420_v60 = vsel %vm5115_vm10, %v1419_v26, %v1415_v18  ;;  %v1429_v37 = vsel %vm5115_vm10, %v1428_v12, %v1424_v40  ;;  %v1480_v32 = vsel %vm5114_vm14, %v1411_v15, %v1402_v53 }
 0x310   : > { %v1489_v56 = vsel %vm5304_vm11, %v1479_v58, 0.0  ;;  %v2886_v50 = vunpack.i.h.bf16 %v2884_v49  ;;  %v2885_v9 = vunpack.i.l.bf16 %v2884_v49  ;;  %v1438_v59 = vsel %vm5115_vm10, %v1437_v19, %v1433_v45  ;;  %v2974_v19 = vld [vmem:[%s5061_s7 + $0x8] sm:$0xff]   ;;  %v2975_v45 = vld [vmem:[%s5061_s7] sm:$0xff]   ;;  %vm5309_vm11 = vmmov %vm5308_vm0 }
 0x311   : > { %1490 = vadd.xlane.f32.xlu0 %v1489_v56  ;;  %v1481_v29 = vsel %vm5113_vm5, %v1420_v60, %v1480_v32  ;;  %v1447_v14 = vsel %vm5115_vm10, %v1446_v42, %v1442_v55  ;;  %2731 = vmatpush3.bf16.msra.mxu0 %v2974_v19 }
 0x312   : > { %v1455_v54 = vrot.slane %v2886_v50, %v4105_v16  ;;  %v1451_v46 = vrot.slane %v2885_v9, %v4102_v62  ;;  %v1482_v58 = vsel %vm5111_vm2, %v1429_v37, %v1481_v29  ;;  %2732 = vmatprep.subr.bf16.mxu0 %v5202_v36  ;;  %v5306_v9 = vmax.f32 %v3283_v51, 0.0 }
 0x313   : > { %v2889_v52 = vpop.permute.xlu1 %2888  ;;  %v1483_v56 = vsel %vm5110_vm4, %v1438_v59, %v1482_v58  ;;  %vm5318_vm4 = vcmp.ne.s32.totalorder %v3310_v6, 0 }
 0x314   : > { %v2891_v10 = vunpack.i.h.bf16 %v2889_v52  ;;  %v2890_v61 = vunpack.i.l.bf16 %v2889_v52  ;;  %v1456_v47 = vsel %vm5115_vm10, %v1455_v54, %v1451_v46  ;;  %v1484_v38 = vsel %vm5109_vm6, %v1447_v14, %v1483_v56  ;;  %v2976_v14 = vld [vmem:[%s5060_s6 + $0x8] sm:$0xff]  }
 0x315   : > { %v1485_v12 = vsel %vm5107_vm13, %v1456_v47, %v1484_v38  ;;  %2733 = vmatpush3.bf16.msra.mxu0 %v2975_v45  ;;  %v5307_v46 = vmax.f32 %v3289_v57, 0.0  ;;  %vm5312_vm13 = vmmov %vm5308_vm0  ;;  %v2990_v57 = vld [vmem:[%s3201_s30] sm:$0xff]   ;;  %s500_s30 = sand.u32 1, %s3043_s19  }
 0x316   : > { %v1464_v26 = vrot.slane %v2891_v10, %v4105_v16  ;;  %v1460_v18 = vrot.slane %v2890_v61, %v4102_v62  ;;  %2746 = vmatprep.subr.bf16.mxu0 %v5202_v36  ;;  %v2977_v47 = vld [vmem:[%s5060_s6] sm:$0xff]   ;;  %s501_s27 = scalar_lea.vmem [#allocation2], %s500_s30  ;;  %s2501_s17 = scalar_lea.sflag [#allocation3], %s500_s30 }
 0x317   : > { %v2636_v45 = vld [vmem:[%s5062_s8] ss:$0 sm:$0xff]  ;;  %s2513_s23 = sshll.u32 %s501_s27, 4  ;;  %s5015_s23 = int_to_ptr.vmem [resolvable:$true] %s2513_s23 }
 0x318   : > { %v1465_v1 = vsel %vm5115_vm10, %v1464_v26, %v1460_v18  ;;  %s2991_s22 = scalar_lea.vmem %s5015_s23, 16  ;;  %p2998_p0 = scmp.lt.s32.totalorder %s5015_s23, %s2996_s1 }
 0x319   : > { %v1486_v40 = vsel %vm5106_vm7, %v1465_v1, %v1485_v12  ;;  %vm5311_vm7 = vmmov %vm5308_vm0  ;;  %p2992_p11 = scmp.ne.s32.totalorder %s5015_s23, %s2991_s22  ;;  %p2999_p1 = scmp.lt.s32.totalorder %s2997_s26, %s2991_s22 }
 0x31a   : > { %v1492_v15 = vsel %vm5305_vm15, %v1486_v40, 0.0  ;;  %vm5310_vm15 = vmmov %vm5308_vm0 }
 0x31b   : > { %1493 = vadd.xlane.f32.xlu1 %v1492_v15  ;;  %p2993_p12 = pnand %p2992_p11, %p3175_p5  ;;  %p3000_p2 = por %p2999_p1, %p2998_p0 }
 0x31d   : > { %p2994_p13 = pneg %p2993_p12 }
 0x31f   : > { %p3001_p3 = pnand %p3000_p2, %p2994_p13 }
 0x39a   : > { %v4181_v49 = vpop.xlane.xlu0 %1490 }
 0x39b   : > { %vm5108_vm1 = vcmp.lt.f32.partialorder %v4181_v49, 13.0 }
 0x39c   : > { %v2627_v42 = vsel %vm5108_vm1, 1.0, %v5202_v36 }
 0x39d   : > { %v1501_v55 = vmul.f32 %v3344_v34, %v2627_v42 }
 0x39f   : > { %v1503_v60 = vmul.f32 %v1501_v55, %v5306_v9 }
 0x3a1   : > { %v1517_v54 = vsel %vm5108_vm1, %v1503_v60, -1e+30  ;;  %v1505_v32 = vsel %vm5308_vm0, %v1503_v60, 0.0  ;;  %vm5313_vm0 = vmmov 0  }
 0x3a2   : > { %v1519_v29 = vsel %vm5310_vm15, %v1517_v54, -inf  ;;  %vm5316_vm15 = vmmov %vm5311_vm7 }
 0x3a4   : > { %v4188_v50 = vpop.xlane.xlu1 %1493 }
 0x3a5   : > { %vm5112_vm12 = vcmp.lt.f32.partialorder %v4188_v50, 13.0 }
 0x3a6   : > { %v2628_v53 = vsel %vm5112_vm12, 1.0, %v5202_v36 }
 0x3a7   : > { %v1502_v37 = vmul.f32 %v3368_v41, %v2628_v53  ;;  %v2637_v53 = vld [vmem:[%s5063_s9] ss:$0 sm:$0xff] }
 0x3a9   : > { %v1504_v34 = vmul.f32 %v1502_v37, %v5307_v46 }
 0x3ab   : > { %v1506_v51 = vsel %vm5309_vm11, %v1504_v34, 0.0  ;;  %v1518_v59 = vsel %vm5112_vm12, %v1504_v34, -1e+30  ;;  %v1528_v52 = vpack.c.bf16 %v1504_v34, %v1503_v60  ;;  %vm5314_vm11 = vcmask 130048  }
 0x3ac   : > { %v4206_v10 = vadd.f32 %v1506_v51, %v1505_v32  ;;  %v1520_v41 = vsel %vm5311_vm7, %v1518_v59, -inf }
 0x3ad   : > { %v4209_v61 = vmax.f32 %v1519_v29, %v1520_v41  ;;  %2725 = vmatpush3.bf16.msra.mxu1 %v1528_v52  ;;  %2735 = vmatmul.mubr.msk.bf16.vlgmr.msra.gmra.mxu0 %vm5312_vm13, %v1528_v52  ;;  %vm5315_vm13 = vmmov %vm5311_vm7 }
 0x3ae   : > { %2738 = vmatprep.subr.bf16.mxu1 %v5202_v36  ;;  %2750 = vmatprep.mubr.msk.bf16.mxu0 %vm5313_vm0, %v5202_v36 }
 0x3b0   : > { %2727 = vmatmul.mubr.msk.bf16.vlgmr.msra.gmra.mxu1 %vm5314_vm11, %v2990_v57 }
 0x3b1   : > { %2742 = vmatprep.mubr.msk.bf16.mxu1 %vm5313_vm0, %v5202_v36  ;;  %2739 = vmatpush3.bf16.msra.mxu1 %v2976_v14 }
 0x3b2   : > { %2740 = vmatprep.subr.bf16.mxu1 %v5202_v36 }
 0x3b5   : > { %2741 = vmatpush3.bf16.msra.mxu1 %v2977_v47 }
 0x3b6   : > { %2754 = vmatprep.subr.bf16.mxu1 %v5202_v36 }
 0x46d   : > { %v1628_v58 = vpop.f32.mrf.mxu0 }
 0x46f   : > { %v2736_v26 = vpop.f32.mrf.mxu0 }
 0x470   : > { %v1563_v18 = vpop.f32.mrf.mxu1 }
 0x471   : > { %v1631_v56 = vpop.f32.mrf.mxu0 }
 0x472   : > { %v2728_v38 = vpop.f32.mrf.mxu1 }
 0x473   : > { %v2737_v1 = vpop.f32.mrf.mxu0 }
 0x474   : > { %v1566_v12 = vpop.f32.mrf.mxu1 }
 0x475   : > { %v1570_v40 = vpack.c.bf16 %v1566_v12, %v1563_v18 }
 0x476   : > { %v2729_v15 = vpop.f32.mrf.mxu1 }
 0x477   : > { %2743 = vmatmul.mubr.msk.bf16.vlgmr.msra.gmra.mxu1 %vm5315_vm13, %v1570_v40 }
 0x478   : > { %2758 = vmatprep.mubr.msk.bf16.mxu1 %vm5313_vm0, %v5202_v36 }
 0x537   : > { %v1684_v19 = vpop.f32.mrf.mxu1 }
 0x538   : > { %v1685_v42 = vadd.f32 %v1684_v19, %v1628_v58 }
 0x539   : > { %v2744_v55 = vpop.f32.mrf.mxu1 }
 0x53a   : > { %v4233_v9 = vadd.f32 %v2636_v45, %v1685_v42 }
 0x53b   : > { %v1687_v60 = vpop.f32.mrf.mxu1 }
 0x53c   : > { %v1700_v37 = vmax.f32 %v4233_v9, 0.0  ;;  %v1688_v54 = vadd.f32 %v1687_v60, %v1631_v56 }
 0x53d   : > { %v2745_v46 = vpop.f32.mrf.mxu1 }
 0x53e   : > { %v4239_v34 = vadd.f32 %v2636_v45, %v1688_v54  ;;  %v1709_v32 = vmul.f32 %v2637_v53, %v1700_v37  ;;  %v5338_v54 = vmov 0  ;;  %v5340_v46 = vld [vmem:[#allocation14_spill] sm:$0xff] }
 0x540   : > { %v1701_v51 = vmax.f32 %v4239_v34, 0.0  ;;  %v1711_v59 = vsel %vm5311_vm7, %v1709_v32, 0.0  ;;  %v5344_v32 = vld [vmem:[#allocation11_spill] sm:$0xff] }
 0x541   : > { %1712 = vadd.xlane.f32.xlu0 %v1711_v59 }
 0x542   : > { %v1710_v52 = vmul.f32 %v2637_v53, %v1701_v51 }
 0x544   : > { %v1714_v29 = vsel %vm5316_vm15, %v1710_v52, 0.0  ;;  %v5348_v52 = vld [vmem:[#allocation15_spill] sm:$0xff] }
 0x545   : > { %1715 = vadd.xlane.f32.xlu0 %v1714_v29  ;;  %v5444_v29 = vmov 0 }
 0x5ca   : > { %v1713_v41 = vpop.xlane.xlu0 %1712 }
 0x5cb   : > { %2986 = vtanh.f32 %v1713_v41 }
 0x5ce   : > { %v1716_v57 = vpop.xlane.xlu0 %1715 }
 0x5cf   : > { %2988 = vtanh.f32 %v1716_v57 }
 0x5d8   : > { %v4248_v14 = vpop.eup %2986 }
 0x5d9   : > { %v4253_v47 = vsel %vm5108_vm1, %v4248_v14, -1e+30  ;;  %vm5317_vm1 = vcmp.ne.s32.totalorder %v3298_v63, 0 }
 0x5da   : > { %v1730_v26 = vrot.slane %v4253_v47, %v3226_v11  ;;  %v1726_v40 = vrot.slane %v4253_v47, %v3240_v17  ;;  %v1734_v15 = vrot.slane %v4253_v47, %v3231_v13  ;;  %v1738_v55 = vrot.slane %v4253_v47, %v3246_v21 }
 0x5db   : > { %v4327_v60 = vrot.slane %v4253_v47, %v3265_v31 }
 0x5dc   : > { %v4255_v58 = vpop.eup %2988  ;;  %vm1805_vm11 = vcmp.gt.f32.partialorder %v4253_v47, %v1730_v26  ;;  %vm1837_vm13 = vcmp.eq.f32.partialorder %v4253_v47, %v1730_v26 }
 0x5dd   : > { %v4262_v18 = vsel %vm5112_vm12, %v4255_v58, -1e+30  ;;  %vm1869_vm6 = vmand %vm1837_vm13, %vm5317_vm1  ;;  %vm5320_vm1 = vcmp.ne.s32.totalorder %v3306_v4, 0  ;;  %v4321_v4 = vrot.slane %v4253_v47, %v3259_v28  ;;  %vm1847_vm9 = vcmp.eq.f32.partialorder %v4253_v47, %v4327_v60 }
 0x5de   : > { %vm1806_vm7 = vcmp.gt.f32.partialorder %v4262_v18, %v1730_v26  ;;  %vm1838_vm15 = vcmp.eq.f32.partialorder %v4262_v18, %v1730_v26  ;;  %v4274_v56 = vrot.slane %v4262_v18, %v3259_v28  ;;  %vm1901_vm12 = vmor %vm1805_vm11, %vm1869_vm6  ;;  %v4278_v38 = vrot.slane %v4262_v18, %v3265_v31 }
 0x5df   : > { %vm1870_vm2 = vmand %vm1838_vm15, %vm5318_vm4  ;;  %v4282_v1 = vrot.slane %v4262_v18, %v3275_v44  ;;  %v2640_v63 = vsel %vm1901_vm12, 1.0, %v5202_v36  ;;  %vm1835_vm11 = vcmp.eq.f32.partialorder %v4253_v47, %v1726_v40  ;;  %vm1836_vm13 = vcmp.eq.f32.partialorder %v4262_v18, %v1726_v40 }
 0x5e0   : > { %vm1902_vm5 = vmor %vm1806_vm7, %vm1870_vm2  ;;  %vm1803_vm7 = vcmp.gt.f32.partialorder %v4253_v47, %v1726_v40  ;;  %vm5319_vm15 = vcmp.ne.s32.totalorder %v3302_v2, 0  ;;  %vm1804_vm10 = vcmp.gt.f32.partialorder %v4262_v18, %v1726_v40  ;;  %v4316_v2 = vrot.slane %v4253_v47, %v3252_v24  ;;  %v5374_v40 = vld [vmem:[#allocation10_spill] sm:$0xff] }
 0x5e1   : > { %v2641_v12 = vsel %vm1902_vm5, 1.0, %v5202_v36  ;;  %vm1867_vm14 = vmand %vm1835_vm11, %vm5319_vm15  ;;  %v4348_v31 = vrot.slane %v4253_v47, %v3275_v44  ;;  %v4409_v59 = vrot.slane %v4262_v18, %v3231_v13  ;;  %v5353_v13 = vmov 0 }
 0x5e2   : > { %v2897_v6 = vpack.i.bf16 %v2641_v12, %v2640_v63  ;;  %vm1868_vm6 = vmand %vm1836_vm13, %vm5320_vm1  ;;  %vm1839_vm1 = vcmp.eq.f32.partialorder %v4253_v47, %v1734_v15  ;;  %vm1843_vm11 = vcmp.eq.f32.partialorder %v4253_v47, %v4316_v2  ;;  %vm1844_vm13 = vcmp.eq.f32.partialorder %v4262_v18, %v4316_v2  ;;  %v5465_v63 = vld [vmem:[#allocation17_spill] sm:$0xff] }
 0x5e3   : > { %vm1899_vm4 = vmor %vm1803_vm7, %vm1867_vm14  ;;  %vm1841_vm14 = vcmp.eq.f32.partialorder %v4253_v47, %v1738_v55  ;;  %vm5324_vm7 = vcmp.ne.s32.totalorder %v3300_v0, 0  ;;  %v4360_v0 = vrot.slane %v4262_v18, %v3240_v17  ;;  %v5336_v17 = vld [vmem:[#allocation7_spill] sm:$0xff]  ;;  %v4431_v41 = vrot.slane %v4262_v18, %v3246_v21 }
 0x5e4   : > { %2898 = vperm.xlu0 %2816, %v2897_v6   ;;  %vm1900_vm8 = vmor %vm1804_vm10, %vm1868_vm6  ;;  %v2638_v19 = vsel %vm1899_vm4, 1.0, %v5202_v36  ;;  %vm1840_vm10 = vcmp.eq.f32.partialorder %v4262_v18, %v1734_v15  ;;  %vm5321_vm4 = vcmp.ne.s32.totalorder %v3330_v22, 0  ;;  %vm5337_vm5 = vcmp.ne.s32.totalorder %v5336_v17, 0 }
 0x5e5   : > { %v2639_v45 = vsel %vm1900_vm8, 1.0, %v5202_v36  ;;  %vm1842_vm8 = vcmp.eq.f32.partialorder %v4262_v18, %v1738_v55  ;;  %vm4332_vm6 = vmand %vm1839_vm1, %vm5321_vm4  ;;  %vm1845_vm1 = vcmp.eq.f32.partialorder %v4253_v47, %v4321_v4  ;;  %vm5327_vm4 = vcmp.ne.s32.totalorder %v3338_v27, 0 }
 0x5e6   : > { %v2892_v42 = vpack.i.bf16 %v2639_v45, %v2638_v19  ;;  %vm4342_vm15 = vmand %vm1840_vm10, %vm5324_vm7  ;;  %vm1846_vm10 = vcmp.eq.f32.partialorder %v4262_v18, %v4321_v4  ;;  %vm5330_vm7 = vcmp.ne.s32.totalorder %v3308_v5, 0  ;;  %v5334_v27 = vmov 0  ;;  %v5380_v45 = vld [vmem:[#allocation12_spill] sm:$0xff] }
 0x5e7   : > { %vm4354_vm12 = vmand %vm1841_vm14, %vm5327_vm4  ;;  %vm5333_vm14 = vcmp.ne.s32.totalorder %v3342_v33, 0  ;;  %v4386_v5 = vrot.slane %v4262_v18, %v3226_v11  ;;  %v5342_v33 = vmov 0  ;;  %v5346_v11 = vmov 0 }
 0x5e8   : > { %2893 = vperm.xlu1 %2810, %v2892_v42   ;;  %vm4366_vm3 = vmand %vm1842_vm8, %vm5330_vm7  ;;  %vm1848_vm8 = vcmp.eq.f32.partialorder %v4262_v18, %v4327_v60  ;;  %vm5341_vm7 = vcmp.ne.s32.totalorder %v5340_v46, 0  ;;  %v4454_v21 = vrot.slane %v4262_v18, %v3252_v24  ;;  %v5367_v24 = vld [vmem:[#allocation8_spill] sm:$0xff]  ;;  %v5383_v42 = vmov 0 }
 0x5e9   : > { %vm4374_vm4 = vmand %vm1843_vm11, %vm5333_vm14  ;;  %vm5345_vm14 = vcmp.ne.s32.totalorder %v5344_v32, 0  ;;  %vm5349_vm11 = vcmp.ne.s32.totalorder %v5348_v52, 0  ;;  %v5425_v46 = vmov 0 }
 0x5ea   : > { %v5335_v27 = vsel %vm4374_vm4, 4294967295, %v5334_v27  ;;  %vm4380_vm2 = vmand %vm1844_vm13, %vm5337_vm5  ;;  %vm1849_vm5 = vcmp.eq.f32.partialorder %v4253_v47, %v4348_v31  ;;  %vm1850_vm13 = vcmp.eq.f32.partialorder %v4262_v18, %v4348_v31 }
 0x5eb   : > { %v5339_v54 = vsel %vm4380_vm2, 4294967295, %v5338_v54  ;;  %vm4392_vm0 = vmand %vm1845_vm1, %vm5341_vm7  ;;  %vm1851_vm7 = vcmp.eq.f32.partialorder %v4253_v47, %v4360_v0 }
 0x5ec   : > { %v5343_v33 = vsel %vm4392_vm0, 4294967295, %v5342_v33  ;;  %vm4403_vm4 = vmand %vm1846_vm10, %vm5345_vm14  ;;  %vm1852_vm14 = vcmp.eq.f32.partialorder %v4262_v18, %v4360_v0  ;;  %vm5355_vm10 = vcmp.ne.s32.totalorder %v3851_v39, 0  ;;  %v5362_v39 = vld [vmem:[#allocation6_spill] sm:$0xff] }
 0x5ed   : > { %v5347_v11 = vsel %vm4403_vm4, 4294967295, %v5346_v11  ;;  %vm4416_vm0 = vmand %vm1847_vm9, %vm5349_vm11  ;;  %vm5352_vm4 = vcmp.ne.s32.totalorder %v3332_v23, 0  ;;  %v5359_v23 = vmov 0 }
 0x5ee   : > { %vm4425_vm2 = vmand %vm1848_vm8, %vm5352_vm4  ;;  %vm5358_vm4 = vcmp.ne.s32.totalorder %v3990_v8, 0  ;;  %v5461_v8 = vmov 0 }
 0x5ef   : > { %v5354_v13 = vsel %vm4425_vm2, 4294967295, %v5353_v13  ;;  %vm4438_vm1 = vmand %vm1849_vm5, %vm5355_vm10  ;;  %vm5361_vm2 = vcmp.gt.f32.partialorder %v4253_v47, %v1734_v15  ;;  %vm5363_vm10 = vcmp.ne.s32.totalorder %v5362_v39, 0  ;;  %v5458_v39 = vld [vmem:[#allocation16_spill] sm:$0xff] }
 0x5f0   : > { %vm4444_vm8 = vmand %vm1850_vm13, %vm5358_vm4  ;;  %vm5366_vm13 = vcmp.gt.f32.partialorder %v4262_v18, %v1734_v15 }
 0x5f1   : > { %v5360_v23 = vsel %vm4444_vm8, 4294967295, %v5359_v23  ;;  %vm1903_vm9 = vmor %vm5361_vm2, %vm4332_vm6  ;;  %vm1855_vm6 = vcmp.eq.f32.partialorder %v4253_v47, %v4409_v59  ;;  %vm5368_vm8 = vcmp.ne.s32.totalorder %v5367_v24, 0 }
 0x5f2   : > { %vm4460_vm11 = vmand %vm1851_vm7, %vm5363_vm10  ;;  %vm5371_vm7 = vcmp.gt.f32.partialorder %v4253_v47, %v1738_v55  ;;  %v2642_v12 = vsel %vm1903_vm9, 1.0, %v5202_v36 }
 0x5f3   : > { %vm1904_vm4 = vmor %vm5366_vm13, %vm4342_vm15  ;;  %vm5376_vm13 = vcmp.eq.f32.partialorder %v4253_v47, %v4386_v5  ;;  %vm5381_vm15 = vcmp.ne.s32.totalorder %v5380_v45, 0 }
 0x5f4   : > { %vm4474_vm5 = vmand %vm1852_vm14, %vm5368_vm8  ;;  %v2643_v6 = vsel %vm1904_vm4, 1.0, %v5202_v36  ;;  %vm1856_vm14 = vcmp.eq.f32.partialorder %v4262_v18, %v4409_v59  ;;  %vm5375_vm8 = vcmp.ne.s32.totalorder %v5374_v40, 0  ;;  %vm5385_vm4 = vcmp.ne.s32.totalorder %v3334_v25, 0 }
 0x5f5   : > { %vm4482_vm10 = vmor %vm5371_vm7, %vm4354_vm12  ;;  %vm5379_vm12 = vcmp.gt.f32.partialorder %v4262_v18, %v1738_v55  ;;  %v2902_v19 = vpack.i.bf16 %v2643_v6, %v2642_v12  ;;  %v5386_v55 = vmov 0  ;;  %v5393_v25 = vmov 0 }
 0x5f6   : > { %vm4497_vm2 = vmand %vm5376_vm13, %vm5375_vm8  ;;  %vm5382_vm8 = vcmp.eq.f32.partialorder %v4262_v18, %v4386_v5  ;;  %v5467_v12 = vmov 0 }
 0x5f7   : > { %vm1906_vm9 = vmor %vm5379_vm12, %vm4366_vm3  ;;  %2903 = vperm.xlu0 %2816, %v2902_v19   ;;  %vm5400_vm12 = vcmp.eq.f32.partialorder %v4253_v47, %v4431_v41  ;;  %vm5416_vm3 = vcmp.eq.f32.partialorder %v4253_v47, %v4454_v21 }
 0x5f8   : > { %vm4514_vm13 = vmand %vm5382_vm8, %vm5381_vm15  ;;  %v2645_v53 = vsel %vm1906_vm9, 1.0, %v5202_v36  ;;  %vm5388_vm15 = vnez %v5339_v54  ;;  %vm5389_vm9 = vcmp.gt.f32.partialorder %v4262_v18, %v4316_v2 }
 0x5f9   : > { %v5384_v42 = vsel %vm4514_vm13, 4294967295, %v5383_v42  ;;  %vm4528_vm7 = vmand %vm1855_vm6, %vm5385_vm4  ;;  %vm5392_vm6 = vcmp.ne.s32.totalorder %v3304_v3, 0  ;;  %v2644_v3 = vsel %vm4482_vm10, 1.0, %v5202_v36  ;;  %vm5404_vm10 = vcmp.gt.f32.partialorder %v4253_v47, %v4321_v4 }
 0x5fa   : > { %v5387_v55 = vsel %vm4528_vm7, 4294967295, %v5386_v55  ;;  %vm4537_vm8 = vmor %vm5389_vm9, %vm5388_vm15  ;;  %vm5395_vm15 = vnez %v5335_v27  ;;  %vm5396_vm9 = vcmp.gt.f32.partialorder %v4253_v47, %v4316_v2  ;;  %v5401_v2 = vmov 0 }
 0x5fb   : > { %vm4550_vm4 = vmand %vm1856_vm14, %vm5392_vm6  ;;  %vm5399_vm6 = vcmp.ne.s32.totalorder %v3340_v30, 0  ;;  %v2907_v27 = vpack.i.bf16 %v2645_v53, %v2644_v3  ;;  %v5409_v30 = vmov 0 }
 0x5fc   : > { %v5394_v25 = vsel %vm4550_vm4, 4294967295, %v5393_v25  ;;  %vm4559_vm7 = vmor %vm5396_vm9, %vm5395_vm15  ;;  %vm5403_vm15 = vnez %v5343_v33 }
 0x5fd   : > { %vm4575_vm4 = vmand %vm5400_vm12, %vm5399_vm6  ;;  %vm5407_vm12 = vcmp.ne.s32.totalorder %v3312_v7, 0  ;;  %vm5408_vm6 = vcmp.eq.f32.partialorder %v4262_v18, %v4431_v41  ;;  %v2647_v7 = vsel %vm4537_vm8, 1.0, %v5202_v36  ;;  %vm5419_vm8 = vcmp.gt.f32.partialorder %v4253_v47, %v4327_v60  ;;  %2908 = vperm.xlu0 %2816, %v2907_v27  }
 0x5fe   : > { %v5402_v2 = vsel %vm4575_vm4, 4294967295, %v5401_v2  ;;  %vm4584_vm9 = vmor %vm5404_vm10, %vm5403_vm15  ;;  %vm5411_vm15 = vnez %v5347_v11  ;;  %vm5412_vm10 = vcmp.gt.f32.partialorder %v4262_v18, %v4321_v4  ;;  %v5417_v4 = vmov 0 }
 0x5ff   : > { %vm4597_vm4 = vmand %vm5408_vm6, %vm5407_vm12  ;;  %vm5415_vm6 = vcmp.ne.s32.totalorder %v3346_v35, 0  ;;  %v5422_v35 = vld [vmem:[#allocation9_spill] sm:$0xff]  ;;  %vm5427_vm12 = vnez %v5354_v13  ;;  %v2646_v32 = vsel %vm4559_vm7, 1.0, %v5202_v36  ;;  %vm5435_vm7 = vcmp.gt.f32.partialorder %v4253_v47, %v4348_v31 }
 0x600   : > { %v5410_v30 = vsel %vm4597_vm4, 4294967295, %v5409_v30  ;;  %vm4606_vm13 = vmor %vm5412_vm10, %vm5411_vm15  ;;  %vm5423_vm14 = vcmp.ne.s32.totalorder %v5422_v35, 0  ;;  %v5436_v11 = vmov 0  ;;  %vm5439_vm10 = vcmp.gt.f32.partialorder %v4262_v18, %v4348_v31 }
 0x601   : > { %vm4622_vm4 = vmand %vm5416_vm3, %vm5415_vm6  ;;  %vm5424_vm3 = vcmp.eq.f32.partialorder %v4262_v18, %v4454_v21  ;;  %v2912_v52 = vpack.i.bf16 %v2647_v7, %v2646_v32  ;;  %v2649_v31 = vsel %vm4606_vm13, 1.0, %v5202_v36 }
 0x602   : > { %v5418_v4 = vsel %vm4622_vm4, 4294967295, %v5417_v4  ;;  %vm4631_vm15 = vmor %vm5419_vm8, %vm4416_vm0  ;;  %vm5428_vm0 = vcmp.gt.f32.partialorder %v4262_v18, %v4327_v60 }
 0x603   : > { %vm4642_vm6 = vmand %vm5424_vm3, %vm5423_vm14  ;;  %vm5431_vm3 = vcmp.ne.s32.totalorder %v3414_v48, 0  ;;  %2913 = vperm.xlu0 %2816, %v2912_v52   ;;  %v2650_v45 = vsel %vm4631_vm15, 1.0, %v5202_v36 }
 0x604   : > { %v5426_v46 = vsel %vm4642_vm6, 4294967295, %v5425_v46  ;;  %vm4651_vm8 = vmor %vm5428_vm0, %vm5427_vm12  ;;  %vm5432_vm6 = vcmp.eq.f32.partialorder %v4253_v47, %v4274_v56  ;;  %vm5438_vm0 = vnez %v5360_v23 }
 0x605   : > { %vm4667_vm4 = vmand %vm5432_vm6, %vm5431_vm3  ;;  %vm5442_vm3 = vcmp.ne.s32.totalorder %v3328_v20, 0  ;;  %v2651_v6 = vsel %vm4651_vm8, 1.0, %v5202_v36  ;;  %vm5475_vm8 = vnez %v5402_v2  ;;  %vm5485_vm15 = vnez %v5426_v46 }
 0x606   : > { %vm4676_vm12 = vmor %vm5435_vm7, %vm4438_vm1  ;;  %vm5443_vm1 = vcmp.eq.f32.partialorder %v4262_v18, %v4274_v56 }
 0x607   : > { %v5437_v11 = vsel %vm4676_vm12, 4294967295, %v5436_v11  ;;  %vm4685_vm14 = vmor %vm5439_vm10, %vm5438_vm0  ;;  %vm5446_vm10 = vcmp.gt.f32.partialorder %v4253_v47, %v4360_v0  ;;  %vm1866_vm12 = vcmp.eq.f32.partialorder %v4262_v18, %v4282_v1 }
 0x608   : > { %vm4696_vm7 = vmand %vm5443_vm1, %vm5442_vm3  ;;  %vm5447_vm3 = vcmp.ne.s32.totalorder %v3715_v43, 0  ;;  %vm5448_vm1 = vcmp.eq.f32.partialorder %v4253_v47, %v4278_v38  ;;  %v5452_v43 = vld [vmem:[#allocation13_spill] sm:$0xff]  ;;  %v2653_v53 = vsel %vm4685_vm14, 1.0, %v5202_v36  ;;  %vm5488_vm14 = vcmp.gt.f32.partialorder %v4253_v47, %v4274_v56 }
 0x609   : > { %v5445_v29 = vsel %vm4696_vm7, 4294967295, %v5444_v29  ;;  %vm1915_vm0 = vmor %vm5446_vm10, %vm4460_vm11  ;;  %vm5451_vm11 = vcmp.gt.f32.partialorder %v4262_v18, %v4360_v0  ;;  %vm5453_vm6 = vcmp.ne.s32.totalorder %v5452_v43, 0  ;;  %v2648_v0 = vsel %vm4584_vm9, 1.0, %v5202_v36 }
 0x60a   : > { %vm4717_vm7 = vmand %vm5448_vm1, %vm5447_vm3  ;;  %v2654_v13 = vsel %vm1915_vm0, 1.0, %v5202_v36  ;;  %vm5454_vm3 = vcmp.eq.f32.partialorder %v4262_v18, %v4278_v38  ;;  %v2917_v26 = vpack.i.bf16 %v2649_v31, %v2648_v0  ;;  %vm5466_vm0 = vcmp.ne.s32.totalorder %v5465_v63, 0 }
 0x60b   : > { %vm1916_vm13 = vmor %vm5451_vm11, %vm4474_vm5  ;;  %vm5457_vm5 = vcmp.gt.f32.partialorder %v4253_v47, %v4386_v5 }
 0x60c   : > { %vm4734_vm1 = vmand %vm5454_vm3, %vm5453_vm6  ;;  %v2655_v23 = vsel %vm1916_vm13, 1.0, %v5202_v36  ;;  %vm5459_vm6 = vcmp.ne.s32.totalorder %v5458_v39, 0  ;;  %vm5460_vm3 = vcmp.eq.f32.partialorder %v4253_v47, %v4282_v1  ;;  %vm1826_vm13 = vcmp.gt.f32.partialorder %v4262_v18, %v4431_v41  ;;  %2918 = vperm.xlu0 %2816, %v2917_v26  }
 0x60d   : > { %vm1917_vm11 = vmor %vm5457_vm5, %vm4497_vm2  ;;  %vm5463_vm2 = vnez %v5384_v42  ;;  %vm5464_vm5 = vcmp.gt.f32.partialorder %v4262_v18, %v4386_v5  ;;  %v2932_v24 = vpack.i.bf16 %v2655_v23, %v2654_v13  ;;  %v2922_v42 = vpack.i.bf16 %v2651_v6, %v2650_v45 }
 0x60e   : > { %vm4754_vm10 = vmand %vm5460_vm3, %vm5459_vm6  ;;  %vm5469_vm3 = vnez %v5387_v55  ;;  %v2656_v40 = vsel %vm1917_vm11, 1.0, %v5202_v36  ;;  %vm5476_vm11 = vcmp.gt.f32.partialorder %v4253_v47, %v4431_v41 }
 0x60f   : > { %v5462_v8 = vsel %vm4754_vm10, 4294967295, %v5461_v8  ;;  %vm1918_vm9 = vmor %vm5464_vm5, %vm5463_vm2  ;;  %vm5470_vm10 = vcmp.gt.f32.partialorder %v4253_v47, %v4409_v59  ;;  %vm5474_vm5 = vcmp.gt.f32.partialorder %v4262_v18, %v4409_v59  ;;  %2933 = vperm.xlu1 %2810, %v2932_v24  }
 0x610   : > { %vm4770_vm6 = vmand %vm1866_vm12, %vm5466_vm0  ;;  %v2657_v15 = vsel %vm1918_vm9, 1.0, %v5202_v36  ;;  %vm1827_vm12 = vcmp.gt.f32.partialorder %v4253_v47, %v4454_v21  ;;  %vm5473_vm0 = vnez %v5394_v25  ;;  %2923 = vperm.xlu0 %2816, %v2922_v42  }
 0x611   : > { %v5468_v12 = vsel %vm4770_vm6, 4294967295, %v5467_v12  ;;  %vm4779_vm2 = vmor %vm5470_vm10, %vm5469_vm3  ;;  %vm1828_vm3 = vcmp.gt.f32.partialorder %v4262_v18, %v4454_v21  ;;  %v2937_v21 = vpack.i.bf16 %v2657_v15, %v2656_v40  ;;  %vm1830_vm6 = vcmp.gt.f32.partialorder %v4262_v18, %v4274_v56 }
 0x612   : > { %vm1920_vm10 = vmor %vm5474_vm5, %vm5473_vm0  ;;  %vm5479_vm0 = vnez %v5410_v30  ;;  %v2658_v55 = vsel %vm4779_vm2, 1.0, %v5202_v36  ;;  %vm5489_vm2 = vnez %v5437_v11 }
 0x613   : > { %vm4802_vm9 = vmor %vm5476_vm11, %vm5475_vm8  ;;  %vm5482_vm8 = vnez %v5418_v4  ;;  %v2659_v28 = vsel %vm1920_vm10, 1.0, %v5202_v36  ;;  %2938 = vperm.xlu1 %2810, %v2937_v21   ;;  %v2652_v22 = vsel %vm5489_vm2, 1.0, %v5202_v36  ;;  %vm5490_vm10 = vnez %v5445_v29 }
 0x614   : > { %vm4811_vm5 = vmor %vm1826_vm13, %vm5479_vm0  ;;  %v2942_v2 = vpack.i.bf16 %v2659_v28, %v2658_v55  ;;  %v2927_v44 = vpack.i.bf16 %v2653_v53, %v2652_v22  ;;  %v2660_v56 = vsel %vm4802_vm9, 1.0, %v5202_v36  ;;  %vm5499_vm2 = vcmask 1041409  }
 0x615   : > { %vm4819_vm11 = vmor %vm1827_vm12, %vm5482_vm8  ;;  %vm1832_vm12 = vcmp.gt.f32.partialorder %v4262_v18, %v4278_v38  ;;  %vm1834_vm8 = vcmp.gt.f32.partialorder %v4262_v18, %v4282_v1  ;;  %v2661_v27 = vsel %vm4811_vm5, 1.0, %v5202_v36  ;;  %vm5494_vm5 = vnez %v5468_v12 }
 0x616   : > { %vm4832_vm13 = vmor %vm1828_vm3, %vm5485_vm15  ;;  %vm5491_vm15 = vcmp.gt.f32.partialorder %v4253_v47, %v4278_v38  ;;  %2928 = vperm.xlu0 %2816, %v2927_v44   ;;  %v2947_v4 = vpack.i.bf16 %v2661_v27, %v2660_v56  ;;  %v2662_v35 = vsel %vm4819_vm11, 1.0, %v5202_v36 }
 0x617   : > { %vm1925_vm0 = vmor %vm5488_vm14, %vm4667_vm4  ;;  %2943 = vperm.xlu1 %2810, %v2942_v2   ;;  %vm5493_vm14 = vcmp.gt.f32.partialorder %v4253_v47, %v4282_v1  ;;  %v2663_v46 = vsel %vm4832_vm13, 1.0, %v5202_v36 }
 0x618   : > { %vm1926_vm3 = vmor %vm1830_vm6, %vm5490_vm10  ;;  %v2664_v3 = vsel %vm1925_vm0, 1.0, %v5202_v36  ;;  %v2952_v33 = vpack.i.bf16 %v2663_v46, %v2662_v35 }
 0x619   : > { %vm1927_vm4 = vmor %vm5491_vm15, %vm4717_vm7  ;;  %v2665_v30 = vsel %vm1926_vm3, 1.0, %v5202_v36  ;;  %vm5492_vm7 = vnez %v5462_v8  ;;  %vm5501_vm3 = vcmask 1042434  }
 0x61a   : > { %vm1928_vm6 = vmor %vm1832_vm12, %vm4734_vm1  ;;  %v2666_v18 = vsel %vm1927_vm4, 1.0, %v5202_v36  ;;  %v2957_v17 = vpack.i.bf16 %v2665_v30, %v2664_v3  ;;  %vm5495_vm1 = vcmask 130112   ;;  %vm5504_vm4 = vcmask 1043459  }
 0x61b   : > { %vm1929_vm9 = vmor %vm5493_vm14, %vm5492_vm7  ;;  %v2667_v38 = vsel %vm1928_vm6, 1.0, %v5202_v36  ;;  %2948 = vperm.xlu1 %2810, %v2947_v4   ;;  %vm5505_vm6 = vcmask 1044484   ;;  %vm5506_vm7 = vcmask 1045509  }
 0x61c   : > { %vm1930_vm0 = vmor %vm1834_vm8, %vm5494_vm5  ;;  %v2668_v7 = vsel %vm1929_vm9, 1.0, %v5202_v36  ;;  %v2962_v54 = vpack.i.bf16 %v2667_v38, %v2666_v18  ;;  %vm5508_vm9 = vcmask 1046534   ;;  %vm5509_vm5 = vcmask 1047559  }
 0x61d   : > { %v2669_v47 = vsel %vm1930_vm0, 1.0, %v5202_v36  ;;  %vm5496_vm11 = vmmov %vm5495_vm1  ;;  %vm5510_vm0 = vcmask 130048  }
 0x61e   : > { %v2967_v1 = vpack.i.bf16 %v2669_v47, %v2668_v7  ;;  %vm5497_vm13 = vmmov %vm5495_vm1 }
 0x61f   : > { %2953 = vperm.xlu1 %2810, %v2952_v33   ;;  %vm5498_vm12 = vmmov %vm5495_vm1 }
 0x620   : > { %vm5500_vm10 = vmmov %vm5495_vm1 }
 0x621   : > { %vm5502_vm8 = vmmov %vm5495_vm1 }
 0x622   : > { %vm5503_vm15 = vmmov %vm5495_vm1 }
 0x623   : > { %2958 = vperm.xlu1 %2810, %v2957_v17   ;;  %vm5507_vm14 = vmmov %vm5495_vm1 }
 0x627   : > { %2963 = vperm.xlu1 %2810, %v2962_v54  }
 0x62b   : > { %2968 = vperm.xlu1 %2810, %v2967_v1  }
 0x65f   : > { %v2899_v32 = vpop.permute.xlu0 %2898 }
 0x660   : > { %v2901_v29 = vunpack.i.h.bf16 %v2899_v32  ;;  %v2900_v31 = vunpack.i.l.bf16 %v2899_v32 }
 0x662   : > { %v2139_v24 = vrot.slane %v2901_v29, %v4105_v16  ;;  %v2135_v26 = vrot.slane %v2900_v31, %v4102_v62 }
 0x663   : > { %v2894_v48 = vpop.permute.xlu1 %2893 }
 0x664   : > { %v2896_v20 = vunpack.i.h.bf16 %v2894_v48  ;;  %v2895_v13 = vunpack.i.l.bf16 %v2894_v48  ;;  %v2140_v53 = vsel %vm5495_vm1, %v2139_v24, %v2135_v26 }
 0x666   : > { %v2130_v5 = vrot.slane %v2896_v20, %v4105_v16  ;;  %v2126_v6 = vrot.slane %v2895_v13, %v4102_v62 }
 0x668   : > { %v2131_v22 = vsel %vm5496_vm11, %v2130_v5, %v2126_v6  ;;  %vm5511_vm11 = vmmov %vm5495_vm1 }
 0x669   : > { %v2267_v7 = vsel %vm5499_vm2, %v2140_v53, %v2131_v22 }
 0x672   : > { %v2904_v60 = vpop.permute.xlu0 %2903 }
 0x673   : > { %v2906_v43 = vunpack.i.h.bf16 %v2904_v60  ;;  %v2905_v57 = vunpack.i.l.bf16 %v2904_v60 }
 0x675   : > { %v2148_v19 = vrot.slane %v2906_v43, %v4105_v16  ;;  %v2144_v45 = vrot.slane %v2905_v57, %v4102_v62 }
 0x677   : > { %v2149_v56 = vsel %vm5497_vm13, %v2148_v19, %v2144_v45  ;;  %vm5512_vm13 = vmmov %vm5495_vm1 }
 0x678   : > { %v2909_v11 = vpop.permute.xlu0 %2908  ;;  %v2268_v35 = vsel %vm5501_vm3, %v2149_v56, %v2267_v7 }
 0x679   : > { %v2911_v23 = vunpack.i.h.bf16 %v2909_v11  ;;  %v2910_v39 = vunpack.i.l.bf16 %v2909_v11 }
 0x67b   : > { %v2157_v59 = vrot.slane %v2911_v23, %v4105_v16  ;;  %v2153_v21 = vrot.slane %v2910_v39, %v4102_v62 }
 0x67d   : > { %v2158_v30 = vsel %vm5498_vm12, %v2157_v59, %v2153_v21  ;;  %vm5513_vm12 = vmmov %vm5495_vm1 }
 0x67e   : > { %v2914_v52 = vpop.permute.xlu0 %2913  ;;  %v2269_v32 = vsel %vm5504_vm4, %v2158_v30, %v2268_v35 }
 0x67f   : > { %v2916_v63 = vunpack.i.h.bf16 %v2914_v52  ;;  %v2915_v12 = vunpack.i.l.bf16 %v2914_v52 }
 0x681   : > { %v2166_v55 = vrot.slane %v2916_v63, %v4105_v16  ;;  %v2162_v28 = vrot.slane %v2915_v12, %v4102_v62 }
 0x683   : > { %v2167_v4 = vsel %vm5500_vm10, %v2166_v55, %v2162_v28  ;;  %vm5514_vm10 = vmmov %vm5495_vm1 }
 0x684   : > { %v2270_v48 = vsel %vm5505_vm6, %v2167_v4, %v2269_v32 }
 0x687   : > { %v2919_v8 = vpop.permute.xlu0 %2918 }
 0x688   : > { %v2921_v40 = vunpack.i.h.bf16 %v2919_v8  ;;  %v2920_v15 = vunpack.i.l.bf16 %v2919_v8 }
 0x68a   : > { %v4882_v0 = vpop.permute.xlu1 %2933  ;;  %v2175_v3 = vrot.slane %v2921_v40, %v4105_v16  ;;  %v2171_v2 = vrot.slane %v2920_v15, %v4102_v62 }
 0x68b   : > { %v2924_v41 = vpop.permute.xlu0 %2923  ;;  %v2936_v24 = vunpack.i.h.bf16 %v4882_v0  ;;  %v2935_v26 = vunpack.i.l.bf16 %v4882_v0 }
 0x68c   : > { %v2926_v25 = vunpack.i.h.bf16 %v2924_v41  ;;  %v2925_v44 = vunpack.i.l.bf16 %v2924_v41  ;;  %v2176_v47 = vsel %vm5502_vm8, %v2175_v3, %v2171_v2  ;;  %vm5515_vm8 = vmmov %vm5495_vm1 }
 0x68d   : > { %v2271_v52 = vsel %vm5506_vm7, %v2176_v47, %v2270_v48  ;;  %v2202_v41 = vrot.slane %v2936_v24, %v4105_v16  ;;  %v2198_v53 = vrot.slane %v2935_v26, %v4102_v62 }
 0x68e   : > { %v2939_v42 = vpop.permute.xlu1 %2938  ;;  %v2184_v27 = vrot.slane %v2926_v25, %v4105_v16  ;;  %v2180_v17 = vrot.slane %v2925_v44, %v4102_v62 }
 0x68f   : > { %v2941_v13 = vunpack.i.h.bf16 %v2939_v42  ;;  %v2940_v43 = vunpack.i.l.bf16 %v2939_v42 }
 0x690   : > { %v2185_v33 = vsel %vm5503_vm15, %v2184_v27, %v2180_v17  ;;  %vm5516_vm15 = vmmov %vm5495_vm1 }
 0x691   : > { %v2929_v38 = vpop.permute.xlu0 %2928  ;;  %v2272_v31 = vsel %vm5508_vm9, %v2185_v33, %v2271_v52  ;;  %v2211_v5 = vrot.slane %v2941_v13, %v4105_v16  ;;  %v2207_v6 = vrot.slane %v2940_v43, %v4102_v62 }
 0x692   : > { %v2944_v18 = vpop.permute.xlu1 %2943  ;;  %v2931_v54 = vunpack.i.h.bf16 %v2929_v38  ;;  %v2930_v46 = vunpack.i.l.bf16 %v2929_v38 }
 0x693   : > { %v2946_v39 = vunpack.i.h.bf16 %v2944_v18  ;;  %v2945_v8 = vunpack.i.l.bf16 %v2944_v18  ;;  %v2212_v28 = vsel %vm5495_vm1, %v2211_v5, %v2207_v6  ;;  %v2203_v18 = vsel %vm5512_vm13, %v2202_v41, %v2198_v53 }
 0x694   : > { %v2193_v1 = vrot.slane %v2931_v54, %v4105_v16  ;;  %v2189_v11 = vrot.slane %v2930_v46, %v4102_v62  ;;  %v2274_v4 = vsel %vm5499_vm2, %v2212_v28, %v2203_v18  ;;  %v1522_v5 = vrot.slane %v4209_v61, 4 }
 0x695   : > { %v2220_v21 = vrot.slane %v2946_v39, %v4105_v16  ;;  %v2216_v42 = vrot.slane %v2945_v8, %v4102_v62  ;;  %vm5521_vm2 = vcmp.lt.f32.partialorder %v4188_v50, 13.0 }
 0x696   : > { %v2949_v60 = vpop.permute.xlu1 %2948  ;;  %v2194_v29 = vsel %vm5507_vm14, %v2193_v1, %v2189_v11  ;;  %vm5517_vm14 = vmmov %vm5495_vm1 }
 0x697   : > { %v2273_v20 = vsel %vm5509_vm5, %v2194_v29, %v2272_v31  ;;  %v2951_v63 = vunpack.i.h.bf16 %v2949_v60  ;;  %v2950_v12 = vunpack.i.l.bf16 %v2949_v60  ;;  %v2221_v30 = vsel %vm5511_vm11, %v2220_v21, %v2216_v42 }
 0x698   : > { %v2283_v23 = vsel %vm5510_vm0, %v2273_v20, 0.0  ;;  %v2275_v46 = vsel %vm5501_vm3, %v2221_v30, %v2274_v4  ;;  %vm5518_vm11 = vcmp.lt.f32.partialorder %v4181_v49, 13.0  ;;  %vm5522_vm3 = vcmask 261120  }
 0x699   : > { %2284 = vadd.xlane.f32.xlu0 %v2283_v23  ;;  %v2229_v0 = vrot.slane %v2951_v63, %v4105_v16  ;;  %v2225_v55 = vrot.slane %v2950_v12, %v4102_v62  ;;  %v2981_v23 = vld [vmem:[%s5064_s10] sm:$0xff]   ;;  %v1508_v63 = vrot.slane %v4206_v10, 4 }
 0x69a   : > { %v2954_v57 = vpop.permute.xlu1 %2953 }
 0x69b   : > { %v2956_v40 = vunpack.i.h.bf16 %v2954_v57  ;;  %v2955_v15 = vunpack.i.l.bf16 %v2954_v57  ;;  %v2230_v17 = vsel %vm5513_vm12, %v2229_v0, %v2225_v55  ;;  %v2978_v57 = vld [vmem:[%s5065_s11 + $0x8] sm:$0xff]   ;;  %v1509_v49 = vadd.f32 %v1508_v63, %v4206_v10 }
 0x69c   : > { %v2276_v60 = vsel %vm5504_vm4, %v2230_v17, %v2275_v46  ;;  %2747 = vmatpush3.bf16.msra.mxu0 %v2978_v57  ;;  %vm5525_vm4 = vmmov %vm5522_vm3 }
 0x69d   : > { %v2238_v25 = vrot.slane %v2956_v40, %v4105_v16  ;;  %v2234_v22 = vrot.slane %v2955_v15, %v4102_v62  ;;  %2748 = vmatprep.subr.bf16.mxu0 %v5202_v36 }
 0x69e   : > { %v2959_v19 = vpop.permute.xlu1 %2958 }
 0x69f   : > { %v2961_v45 = vunpack.i.h.bf16 %v2959_v19  ;;  %v2960_v59 = vunpack.i.l.bf16 %v2959_v19  ;;  %v2239_v54 = vsel %vm5514_vm10, %v2238_v25, %v2234_v22 }
 0x6a0   : > { %v2277_v52 = vsel %vm5505_vm6, %v2239_v54, %v2276_v60  ;;  %vm5526_vm6 = vmmov %vm5522_vm3 }
 0x6a1   : > { %v2247_v2 = vrot.slane %v2961_v45, %v4105_v16  ;;  %v2243_v44 = vrot.slane %v2960_v59, %v4102_v62  ;;  %v1510_v59 = vrot.slane %v1509_v49, 2 }
 0x6a2   : > { %v2964_v3 = vpop.permute.xlu1 %2963 }
 0x6a3   : > { %v2966_v56 = vunpack.i.h.bf16 %v2964_v3  ;;  %v2965_v27 = vunpack.i.l.bf16 %v2964_v3  ;;  %v2248_v33 = vsel %vm5515_vm8, %v2247_v2, %v2243_v44  ;;  %vm5523_vm8 = vmmov %vm5522_vm3  ;;  %v1511_v53 = vadd.f32 %v1510_v59, %v1509_v49 }
 0x6a4   : > { %v2278_v29 = vsel %vm5506_vm7, %v2248_v33, %v2277_v52  ;;  %vm5527_vm7 = vmmov %vm5522_vm3 }
 0x6a5   : > { %v2256_v38 = vrot.slane %v2966_v56, %v4105_v16  ;;  %v2252_v7 = vrot.slane %v2965_v27, %v4102_v62  ;;  %v1512_v25 = vrot.slane %v1511_v53, 1 }
 0x6a6   : > { %v2969_v35 = vpop.permute.xlu1 %2968 }
 0x6a7   : > { %v2971_v47 = vunpack.i.h.bf16 %v2969_v35  ;;  %v2970_v1 = vunpack.i.l.bf16 %v2969_v35  ;;  %v2257_v32 = vsel %vm5516_vm15, %v2256_v38, %v2252_v7  ;;  %vm5524_vm15 = vmmov %vm5522_vm3  ;;  %v1513_v27 = vadd.f32 %v1512_v25, %v1511_v53 }
 0x6a8   : > { %v2279_v20 = vsel %vm5508_vm9, %v2257_v32, %v2278_v29  ;;  %vm5529_vm9 = vcmask 1043456  }
 0x6a9   : > { %v2265_v11 = vrot.slane %v2971_v47, %v4105_v16  ;;  %v2261_v48 = vrot.slane %v2970_v1, %v4102_v62  ;;  %v2979_v62 = vld [vmem:[%s5064_s10 + $0x8] sm:$0xff]   ;;  %v2980_v16 = vld [vmem:[%s5065_s11] sm:$0xff]   ;;  %v1514_v4 = vmul.f32 0.07692308, %v1513_v27 }
 0x6aa   : > { %2755 = vmatpush3.bf16.msra.mxu1 %v2979_v62  ;;  %2749 = vmatpush3.bf16.msra.mxu0 %v2980_v16  ;;  %v2450_v1 = vld [vmem:[%s5067_s13] sm:$0xf] }
 0x6ab   : > { %v2266_v31 = vsel %vm5517_vm14, %v2265_v11, %v2261_v48  ;;  %2756 = vmatprep.subr.bf16.mxu1 %v5202_v36  ;;  %2762 = vmatprep.subr.bf16.mxu0 %v5202_v36  ;;  %vm5528_vm14 = vmmov 0   ;;  %v2456_v33 = vsel %vm5529_vm9, %v2450_v1, 0  ;;  %v2446_v11 = vld [vmem:[%s5066_s12] sm:$0x1] }
 0x6ac   : > { %v2280_v13 = vsel %vm5509_vm5, %v2266_v31, %v2279_v20  ;;  %vm5530_vm5 = vcmask 64512   ;;  %v2451_v16 = vld [vmem:[%s5068_s14] sm:$0x1] }
 0x6ad   : > { %v2286_v43 = vsel %vm5510_vm0, %v2280_v13, 0.0 }
 0x6ae   : > { %2287 = vadd.xlane.f32.xlu1 %v2286_v43  ;;  %2757 = vmatpush3.bf16.msra.mxu1 %v2981_v23 }
 0x722   : > { %v2285_v39 = vpop.xlane.xlu0 %2284 }
 0x723   : > { %vm2289_vm1 = vcmp.lt.f32.partialorder %v2285_v39, 11.0 }
 0x724   : > { %vm4967_vm13 = vmand %vm2289_vm1, %vm5518_vm11 }
 0x725   : > { %v2670_v24 = vsel %vm4967_vm13, 1.0, %v5202_v36 }
 0x726   : > { %v2297_v26 = vmul.f32 %v4248_v14, %v2670_v24  ;;  %v1523_v14 = vmax.f32 %v4209_v61, %v1522_v5 }
 0x728   : > { %v2299_v6 = vmul.f32 %v2297_v26, %v1700_v37 }
 0x72a   : > { %v2313_v19 = vsel %vm4967_vm13, %v2299_v6, -1e+30  ;;  %v2301_v9 = vsel %vm5522_vm3, %v2299_v6, 0.0 }
 0x72b   : > { %v2315_v10 = vsel %vm5524_vm15, %v2313_v19, -inf }
 0x737   : > { %v2288_v12 = vpop.xlane.xlu1 %2287 }
 0x738   : > { %vm2290_vm12 = vcmp.lt.f32.partialorder %v2288_v12, 11.0 }
 0x739   : > { %vm2292_vm10 = vmand %vm2290_vm12, %vm5521_vm2 }
 0x73a   : > { %v2671_v40 = vsel %vm2292_vm10, 1.0, %v5202_v36 }
 0x73b   : > { %v2298_v15 = vmul.f32 %v4255_v58, %v2671_v40  ;;  %v1524_v58 = vrot.slane %v1523_v14, 2 }
 0x73d   : > { %v2300_v45 = vmul.f32 %v2298_v15, %v1701_v51  ;;  %v1525_v28 = vmax.f32 %v1523_v14, %v1524_v58 }
 0x73f   : > { %v2302_v50 = vsel %vm5523_vm8, %v2300_v45, 0.0  ;;  %v2314_v37 = vsel %vm2292_vm10, %v2300_v45, -1e+30  ;;  %v1526_v2 = vrot.slane %v1525_v28, 1 }
 0x740   : > { %v2303_v21 = vadd.f32 %v2302_v50, %v2301_v9  ;;  %v2316_v42 = vsel %vm5525_vm4, %v2314_v37, -inf }
 0x741   : > { %v2317_v41 = vmax.f32 %v2315_v10, %v2316_v42  ;;  %v1527_v17 = vmax.f32 %v1525_v28, %v1526_v2 }
 0x742   : > { %v2304_v61 = vrot.slane %v2303_v21, 4 }
 0x743   : > { %v2318_v0 = vrot.slane %v2317_v41, 4 }
 0x744   : > { %v2305_v55 = vadd.f32 %v2304_v61, %v2303_v21 }
 0x745   : > { %v2319_v34 = vmax.f32 %v2317_v41, %v2318_v0 }
 0x746   : > { %v2306_v51 = vrot.slane %v2305_v55, 2 }
 0x747   : > { %v2320_v22 = vrot.slane %v2319_v34, 2 }
 0x748   : > { %v2307_v3 = vadd.f32 %v2306_v51, %v2305_v55 }
 0x749   : > { %v2321_v44 = vmax.f32 %v2319_v34, %v2320_v22 }
 0x74a   : > { %v2308_v56 = vrot.slane %v2307_v3, 1 }
 0x74b   : > { %v2322_v30 = vrot.slane %v2321_v44, 1 }
 0x74c   : > { %v2309_v18 = vadd.f32 %v2308_v56, %v2307_v3 }
 0x74d   : > { %v2323_v38 = vmax.f32 %v2321_v44, %v2322_v30 }
 0x74e   : > { %v2310_v7 = vmul.f32 0.09090909, %v2309_v18 }
 0x74f   : > { %v2326_v54 = vadd.f32 %v2323_v38, %v1527_v17 }
 0x750   : > { %v2324_v35 = vadd.f32 %v2310_v7, %v1514_v4 }
 0x751   : > { %v2327_v46 = vpack.c.bf16 %v2326_v54, %v2326_v54 }
 0x752   : > { %v2325_v47 = vpack.c.bf16 %v2324_v35, %v2324_v35 }
 0x753   : > { %2751 = vmatmul.mubr.msk.bf16.vlgmr.msra.gmra.mxu0 %vm5526_vm6, %v2327_v46 }
 0x754   : > { %2759 = vmatmul.mubr.msk.bf16.vlgmr.msra.gmra.mxu1 %vm5527_vm7, %v2325_v47  ;;  %2764 = vmatprep.mubr.msk.bf16.mxu0 %vm5528_vm14, %v5202_v36 }
 0x755   : > { %2763 = vmatpush3.bf16.msra.mxu0 %v2456_v33 }
 0x813   : > { %v2385_v32 = vpop.f32.mrf.mxu0 }
 0x814   : > { %v2440_v60 = vpop.f32.mrf.mxu1 }
 0x815   : > { %v2441_v48 = vadd.f32 %v2440_v60, %v2385_v32  ;;  %v2752_v52 = vpop.f32.mrf.mxu0 }
 0x816   : > { %v2760_v29 = vpop.f32.mrf.mxu1 }
 0x817   : > { %v2447_v31 = vadd.f32 %v2446_v11, %v2441_v48  ;;  %v2388_v36 = vpop.f32.mrf.mxu0 }
 0x818   : > { %v2443_v20 = vpop.f32.mrf.mxu1 }
 0x819   : > { %v2448_v13 = vmax.f32 %v2447_v31, 0.0  ;;  %v2753_v43 = vpop.f32.mrf.mxu0 }
 0x81a   : > { %v2761_v57 = vpop.f32.mrf.mxu1 }
 0x81b   : > { %v2449_v62 = vpack.c.bf16 %v2448_v13, %v2448_v13 }
 0x81d   : > { %2765 = vmatmul.mubr.msk.bf16.vlgmr.msra.gmra.mxu0 %vm5530_vm5, %v2449_v62 }
 0x8dd   : > { %v2492_v23 = vpop.f32.mrf.mxu0 }
 0x8de   : > { %v2493_v39 = vadd.f32 %v2492_v23, %v2451_v16 }
 0x8df   : > { %v2766_v8 = vpop.f32.mrf.mxu0 }
 0x8e0   : > { %v2498_v24 = vmax.f32 %v2493_v39, 0.0 }
 0x8e1   : > { %v2495_v26 = vpop.f32.mrf.mxu0 }
 0x8e2   : > { %2499 = vst [vmem:[%s501_s27] sm:$0x1] %v2498_v24 }
 0x8e3   : > { %v2767_v63 = vpop.f32.mrf.mxu0 }
 0x8e4   : > { %3004 = shalt.err (!%p3001_p3)
}
 0x8e5   : > { %s3005_s3 = scalar_lea.hbm %s5013_s0, 16  ;;  %s3009_s16 = scalar_lea.hbm %s5069_s15, 32 }
 0x8e6   : > { %p3006_p4 = scmp.ne.s32.totalorder %s5013_s0, %s3005_s3  ;;  %p3010_p9 = scmp.lt.s32.totalorder %s5013_s0, %s5069_s15 }
 0x8e7   : > { %p3011_p10 = scmp.lt.s32.totalorder %s3009_s16, %s3005_s3 }
 0x8e8   : > { %p3007_p7 = pnand %p3006_p4, %p3175_p5 }
 0x8e9   : > { %p3012_p11 = por %p3011_p10, %p3010_p9 }
 0x8ea   : > { %p3008_p8 = pneg %p3007_p7 }
 0x8ec   : > { %p3013_p12 = pnand %p3012_p11, %p3008_p8 }
 0x8ee   : > { %3016 = shalt.err (!%p3013_p12)
}
 0x8ef   : > { %2768 = dma.vmem_to_hbm [thread:$0]  (%p3175_p5), %s5015_s23, 16, %s5013_s0, %s2501_s17  }
 0x8f0 PF: > { %p2774_p13 = scmp.ge.s32.totalorder %s3051_s21, 2  ;;  %s2525_s1 = sand.u32 1, %s3039_s18  }
 0x8f1   : > { %s2526_s2 = scalar_lea.sflag [#allocation3], %s2525_s1 }
 0x8f2   : > { %p2771_p0 = pnand %p2774_p13, %p3179_p6 }
 0x8f4   : > { %p2772_p1 = pneg %p2771_p0 }
 0x8f6   : > { %3034 = dma.done.wait (%p2772_p1), %s2526_s2, 16  }
 0x8f7   : > { %3036 = vsyncadd (%p2772_p1), %s2526_s2, 4294967280  ;;  %s5531_s22 = sld [smem:[#allocation5_spill]]  ;;  %p25_p2 = scmp.ge.s32.totalorder %s3162_s24, 4  }
 0x8f8   : > { %s5532_s18 = smov %s3043_s19  ;;  %s5533_s19 = smov %s3047_s20 }
 0x8f9   : > { %s5535_s21 = smov %s3162_s24  ;;  %27 = sbr.rel (!%p25_p2) target bundleno = 8 (0x8), region = 118 }
 0x8fd   : > { %s5534_s20 = smov %s5531_s22 }
 0x8fe   :  { %2530 = vsyncpa [#allocation3], 1 }
 0x8ff   :  { %2532 = vsyncpa [#allocation3 + $0x1], 1 }

</bundles_post_ra>
